<compile_context>
chip_gen: v7x
topology: tpu7x:2x2x1
jax: 0.10.0
libtpu: 0.0.40
codegen_flags: <defaults>
</compile_context>

<pallas_src>
import functools
import math

import jax
import jax.numpy as jnp
from jax.experimental import pallas as pl
from jax.experimental.pallas import tpu as pltpu

LN_EPS = 1e-12


# ----------------------------- kernel helpers ------------------------------ #
def _layernorm(x, gamma, beta, eps=LN_EPS):
    mean = jnp.mean(x, axis=-1, keepdims=True)
    var = jnp.mean((x - mean) ** 2, axis=-1, keepdims=True)
    return (x - mean) * jax.lax.rsqrt(var + eps) * gamma + beta


def _gelu(x):
    # TODO(synk): HF BERT/DPR uses erf-based GELU; tanh approximation differs
    # at ~1e-3 per layer.  Kept tanh (routes through EUP, lowers cleanly).
    return 0.5 * x * (1.0 + jnp.tanh(0.7978845608028654 * (x + 0.044715 * x * x * x)))


def _mm(a_bf16, w_bf16):
    """2-D a @ w with bf16 MXU operands and f32 accumulation."""
    return jax.lax.dot_general(
        a_bf16, w_bf16, (((1,), (0,)), ((), ())),
        preferred_element_type=jnp.float32)


def _split_heads(t_bf16, nh, dh, use_reshape):
    """(S, H) bf16 -> (nh, S, dh) bf16, register-level relayout."""
    S = t_bf16.shape[0]
    if use_reshape:
        return jnp.swapaxes(t_bf16.reshape(S, nh, dh), 0, 1)
    return jnp.concatenate(
        [t_bf16[None, :, h * dh:(h + 1) * dh] for h in range(nh)], axis=0)


def _merge_heads(t_bf16, use_reshape):
    """(nh, S, dh) bf16 -> (S, H) bf16."""
    nh, S, dh = t_bf16.shape
    if use_reshape:
        return jnp.swapaxes(t_bf16, 0, 1).reshape(S, nh * dh)
    return jnp.concatenate([t_bf16[h] for h in range(nh)], axis=-1)


@functools.lru_cache(maxsize=None)
def _head_reshape_supported(S, nh, dh):
    """Probe whether the reshape+swapaxes head relayout lowers on this backend."""
    try:
        def _probe(x_ref, o_ref):
            t = jnp.swapaxes(x_ref[...].reshape(S, nh, dh), 0, 1)      # split
            o_ref[...] = jnp.swapaxes(t, 0, 1).reshape(S, nh * dh)     # merge
        fn = pl.pallas_call(
            _probe, out_shape=jax.ShapeDtypeStruct((S, nh * dh), jnp.bfloat16))
        jax.block_until_ready(fn(jnp.ones((S, nh * dh), jnp.bfloat16)))
        return True
    except Exception:
        return False


def _choose_kv_tile(S):
    # 128-256 wide KV tiles keep the per-tile score block small at DPR sizes
    # (S=512) while still feeding the MXU full-depth contractions.
    for t in (256, 128, 64):
        if S % t == 0:
            return t
    return S


@functools.lru_cache(maxsize=None)
def _vmem_limit_bytes():
    """Per-generation scoped-VMEM budget (v5e/v6e: ~100 MiB, v7x: cap - 8 MiB)."""
    cap = 0
    try:
        info = pltpu.get_tpu_info()
        cap = int(getattr(info, "vmem_capacity_bytes", 0) or 0)
    except Exception:
        cap = 0
    if cap >= 96 * (1 << 20):               # v5e / v6e (128 MiB physical)
        return 100 * (1 << 20)
    if cap > 0:                             # v7x (64 MiB physical per TC)
        return max(cap - 8 * (1 << 20), 32 * (1 << 20))
    return 48 * (1 << 20)                   # unknown backend: conservative


# ------------------------------ Pallas kernel ------------------------------ #
def encoder_layer_kernel(num_heads, kv_tile, use_reshape,
                         x_ref, mask_ref, ln0g_ref, ln0b_ref,
                         wq_ref, bq_ref, wk_ref, bk_ref, wv_ref, bv_ref,
                         wo_ref, bo_ref, ln1g_ref, ln1b_ref,
                         w1_ref, b1_ref, w2_ref, b2_ref, ln2g_ref, ln2b_ref,
                         o_ref):
    l = pl.program_id(1)

    # Embedding LayerNorm fused into the first grid step; its result is the
    # layer-0 input.  The activation is carried across the L grid axis in the
    # VMEM-resident output block (same block index for every l), so
    # inter-layer activations never touch HBM.
    @pl.when(l == 0)
    def _():
        o_ref[0] = _layernorm(x_ref[0], ln0g_ref[...], ln0b_ref[...])

    x = o_ref[0]                             # (S, H) f32 resident activation
    bias = mask_ref[0]                       # (1, S) additive attention bias
    S, H = x.shape
    nh = num_heads
    dh = H // nh

    xb = x.astype(jnp.bfloat16)              # single bf16 cast reused by Q/K/V
    # 1/sqrt(dh) is folded into wq / bq on the host (zero in-kernel cost).
    q = _mm(xb, wq_ref[0]) + bq_ref[0]       # (S, H) f32
    k = _mm(xb, wk_ref[0]) + bk_ref[0]
    v = _mm(xb, wv_ref[0]) + bv_ref[0]

    # Register-level head relayout in bf16: (S, H) -> (nh, S, dh).
    qh = _split_heads(q.astype(jnp.bfloat16), nh, dh, use_reshape)
    kh = _split_heads(k.astype(jnp.bfloat16), nh, dh, use_reshape)
    vh = _split_heads(v.astype(jnp.bfloat16), nh, dh, use_reshape)

    # KV-tiled online softmax: never materialize the (nh, S, S) scores.
    # TODO(synk): pack two heads per 128-lane MXU tile for dh=64 on v6e/v7x.
    m_i = jnp.full((nh, S, 1), -jnp.inf, jnp.float32)
    l_i = jnp.zeros((nh, S, 1), jnp.float32)
    acc = jnp.zeros((nh, S, dh), jnp.float32)
    for t in range(S // kv_tile):
        sl = slice(t * kv_tile, (t + 1) * kv_tile)
        s = jnp.einsum("nqd,nkd->nqk", qh, kh[:, sl, :],
                       preferred_element_type=jnp.float32) + bias[:, sl]
        m_new = jnp.maximum(m_i, jnp.max(s, axis=-1, keepdims=True))
        alpha = jnp.exp(m_i - m_new)
        p = jnp.exp(s - m_new)
        l_i = alpha * l_i + jnp.sum(p, axis=-1, keepdims=True)
        acc = alpha * acc + jnp.einsum("nqk,nkd->nqd", p.astype(jnp.bfloat16),
                                       vh[:, sl, :],
                                       preferred_element_type=jnp.float32)
        m_i = m_new

    # TODO(synk): approx reciprocal (EUP slot) gives ~1e-3 rel err in attention
    # weights; switch to exact division if strict parity with torch is needed.
    ctx = (acc * pl.reciprocal(l_i, approx=True)).astype(jnp.bfloat16)

    # Merge heads back to (S, H) and apply ONE K=H output projection.
    attn_out = _mm(_merge_heads(ctx, use_reshape), wo_ref[0]) + bo_ref[0]

    x1 = _layernorm(x + attn_out, ln1g_ref[0], ln1b_ref[0])

    h = _mm(x1.astype(jnp.bfloat16), w1_ref[0]) + b1_ref[0]   # (S, I) f32
    h = _gelu(h).astype(jnp.bfloat16)                         # bf16 intermediate
    ffn = _mm(h, w2_ref[0]) + b2_ref[0]

    o_ref[0] = _layernorm(x1 + ffn, ln2g_ref[0], ln2b_ref[0])


# ------------------------------ pallas wrapper ------------------------------ #
_WEIGHT_ORDER = ["wq", "bq", "wk", "bk", "wv", "bv", "wo", "bo",
                 "ln1_g", "ln1_b", "w1", "b1", "w2", "b2", "ln2_g", "ln2_b"]


def _stack_layer_params(layers, num_heads):
    """Stack per-layer params along a leading L axis; fold 1/sqrt(dh) into Q."""
    H = layers[0]["wq"].shape[0]
    dh = H // num_heads
    scale = 1.0 / math.sqrt(dh)

    def stack(name, fn=lambda a: a):
        return jnp.stack([fn(lyr[name]) for lyr in layers], axis=0)

    out = {k: stack(k) for k in _WEIGHT_ORDER if k not in ("wq", "bq")}
    out["wq"] = stack("wq", lambda w: (w.astype(jnp.float32) * scale)
                      .astype(jnp.bfloat16))
    out["bq"] = stack("bq", lambda b: b * scale)
    return out


def dpr_encoder_pallas(x_emb, mask_bias, emb_ln_g, emb_ln_b, stacked, num_heads):
    B, S, H = x_emb.shape
    L = stacked["wq"].shape[0]
    dh = H // num_heads
    kv_tile = _choose_kv_tile(S)
    use_reshape = _head_reshape_supported(S, num_heads, dh)

    def lspec(arr):  # per-layer stacked weights: stream along the L grid axis
        return pl.BlockSpec((1,) + arr.shape[1:],
                            lambda b, l, nd=arr.ndim: (l,) + (0,) * (nd - 1))

    def cspec(arr):  # grid-invariant tiny params (embedding LayerNorm)
        return pl.BlockSpec(arr.shape, lambda b, l, nd=arr.ndim: (0,) * nd)

    weights = [stacked[k] for k in _WEIGHT_ORDER]

    in_specs = [
        pl.BlockSpec((1, S, H), lambda b, l: (b, 0, 0)),   # embeddings (read at l==0)
        pl.BlockSpec((1, 1, S), lambda b, l: (b, 0, 0)),   # additive mask bias
        cspec(emb_ln_g), cspec(emb_ln_b),
    ] + [lspec(w) for w in weights]

    # TODO(synk): for B==1 (or odd B) on v7x add a parallel query-tile grid
    # axis so both TensorCores are used per example.
    return pl.pallas_call(
        functools.partial(encoder_layer_kernel, num_heads, kv_tile, use_reshape),
        out_shape=jax.ShapeDtypeStruct((B, S, H), jnp.float32),
        grid=(B, L),
        in_specs=in_specs,
        out_specs=pl.BlockSpec((1, S, H), lambda b, l: (b, 0, 0)),
        compiler_params=pltpu.CompilerParams(
            dimension_semantics=("parallel", "arbitrary"),
            vmem_limit_bytes=_vmem_limit_bytes()),
    )(x_emb, mask_bias, emb_ln_g, emb_ln_b, *weights)


# ------------------------------ model glue --------------------------------- #
def init_params(key, cfg):
    H, I = cfg["hidden"], cfg["intermediate"]
    ks = iter(jax.random.split(key, 8 + 16 * max(cfg["num_layers"], 1)))

    def mat(k, shape):
        # MXU operands stored bf16: halves HBM traffic and VMEM residency.
        return (jax.random.normal(k, shape, jnp.float32) * 0.02).astype(jnp.bfloat16)

    def emb(k, shape):
        return jax.random.normal(k, shape, jnp.float32) * 0.02

    params = {
        "word_emb": emb(next(ks), (cfg["vocab"], H)),
        "pos_emb": emb(next(ks), (cfg["max_pos"], H)),
        "type_emb": emb(next(ks), (cfg["type_vocab"], H)),
        "emb_ln_g": jnp.ones((1, H), jnp.float32),
        "emb_ln_b": jnp.zeros((1, H), jnp.float32),
        "layers": [],
    }
    for _ in range(cfg["num_layers"]):
        params["layers"].append({
            "wq": mat(next(ks), (H, H)), "bq": jnp.zeros((1, H), jnp.float32),
            "wk": mat(next(ks), (H, H)), "bk": jnp.zeros((1, H), jnp.float32),
            "wv": mat(next(ks), (H, H)), "bv": jnp.zeros((1, H), jnp.float32),
            "wo": mat(next(ks), (H, H)), "bo": jnp.zeros((1, H), jnp.float32),
            "ln1_g": jnp.ones((1, H), jnp.float32),
            "ln1_b": jnp.zeros((1, H), jnp.float32),
            "w1": mat(next(ks), (H, I)), "b1": jnp.zeros((1, I), jnp.float32),
            "w2": mat(next(ks), (I, H)), "b2": jnp.zeros((1, H), jnp.float32),
            "ln2_g": jnp.ones((1, H), jnp.float32),
            "ln2_b": jnp.zeros((1, H), jnp.float32),
        })
    return params


def dpr_context_encoder_forward(params, input_ids, attention_mask, cfg):
    """Equivalent of CustomDPRContextEncoder.forward -> pooler_output (B, H)."""
    B, S = input_ids.shape
    # TODO(synk): embedding-table gathers and CLS pooling stay in plain JAX
    # (a DMA-gather Pallas kernel would add complexity for negligible gain).
    word = jnp.take(params["word_emb"], input_ids, axis=0)            # (B,S,H)
    pos = jnp.take(params["pos_emb"], jnp.arange(S), axis=0)[None]    # (1,S,H)
    tok = jnp.take(params["type_emb"],
                   jnp.zeros((B, S), jnp.int32), axis=0)              # (B,S,H)
    x = (word + pos + tok).astype(jnp.float32)

    mask_bias = ((1.0 - attention_mask.astype(jnp.float32)) * -1e9)[:, None, :]

    if not params["layers"]:  # degenerate config: standalone embedding LN
        x = _layernorm(x, params["emb_ln_g"], params["emb_ln_b"])
        return x[:, 0, :]

    stacked = _stack_layer_params(params["layers"], cfg["num_heads"])
    out = dpr_encoder_pallas(x, mask_bias, params["emb_ln_g"], params["emb_ln_b"],
                             stacked, cfg["num_heads"])

    # DPR's pooler_output is the [CLS] (position-0) hidden state.
    return out[:, 0, :]


# ---------------------------------- main ------------------------------------ #
if __name__ == "__main__":
    cfg = dict(vocab=100, hidden=32, num_heads=2, num_layers=2,
               intermediate=64, max_pos=16, type_vocab=2)

    key = jax.random.PRNGKey(0)
    kp, kid, kmask = jax.random.split(key, 3)

    params = init_params(kp, cfg)

    B, S = 2, 8
    input_ids = jax.random.randint(kid, (B, S), 0, cfg["vocab"], dtype=jnp.int32)
    # all-ones attention mask except last two tokens of batch element 1 padded
    attention_mask = jnp.ones((B, S), jnp.int32).at[1, -2:].set(0)

    pooled = dpr_context_encoder_forward(params, input_ids, attention_mask, cfg)
    pooled = jax.block_until_ready(pooled)

    assert pooled.shape == (B, cfg["hidden"])
    assert jnp.all(jnp.isfinite(pooled))
    print("KERNEL_OK")
</pallas_src>

<mosaic_0001>
module attributes {stable_mosaic.version = 11 : i64} {
  func.func @_probe(%arg0: memref<8x32xbf16, #tpu.memory_space<vmem>>, %arg1: memref<8x32xbf16, #tpu.memory_space<vmem>>) attributes {dimension_semantics = [], scalar_prefetch = 0 : i64, scratch_operands = 0 : i64, tpu.core_type = #tpu.core_type<tc>} {
    %c0 = arith.constant 0 : index
    %c0_0 = arith.constant 0 : index
    %0 = vector.load %arg0[%c0, %c0_0] : memref<8x32xbf16, #tpu.memory_space<vmem>>, vector<8x32xbf16>
    %1 = vector.shape_cast %0 : vector<8x32xbf16> to vector<8x2x16xbf16>
    %2 = tpu.transpose %1, [1, 0, 2] : vector<8x2x16xbf16> -> vector<2x8x16xbf16>
    %3 = tpu.transpose %2, [1, 0, 2] : vector<2x8x16xbf16> -> vector<8x2x16xbf16>
    %4 = vector.shape_cast %3 : vector<8x2x16xbf16> to vector<8x32xbf16>
    %c0_1 = arith.constant 0 : index
    %c0_2 = arith.constant 0 : index
    %5 = vector.load %arg1[%c0_1, %c0_2] : memref<8x32xbf16, #tpu.memory_space<vmem>>, vector<8x32xbf16>
    tpu.vector_store %arg1[%c0_1, %c0_2], %4 {strides = array<i32>} : memref<8x32xbf16, #tpu.memory_space<vmem>>, vector<8x32xbf16>,
    return
  }
}

module attributes {stable_mosaic.version = 11 : i64} {
  func.func @encoder_layer_kernel(%arg0: i32, %arg1: i32, %arg2: memref<1x8x32xf32, #tpu.memory_space<vmem>>, %arg3: memref<1x1x8xf32, #tpu.memory_space<vmem>>, %arg4: memref<1x32xf32, #tpu.memory_space<vmem>>, %arg5: memref<1x32xf32, #tpu.memory_space<vmem>>, %arg6: memref<1x32x32xbf16, #tpu.memory_space<vmem>>, %arg7: memref<1x1x32xf32, #tpu.memory_space<vmem>>, %arg8: memref<1x32x32xbf16, #tpu.memory_space<vmem>>, %arg9: memref<1x1x32xf32, #tpu.memory_space<vmem>>, %arg10: memref<1x32x32xbf16, #tpu.memory_space<vmem>>, %arg11: memref<1x1x32xf32, #tpu.memory_space<vmem>>, %arg12: memref<1x32x32xbf16, #tpu.memory_space<vmem>>, %arg13: memref<1x1x32xf32, #tpu.memory_space<vmem>>, %arg14: memref<1x1x32xf32, #tpu.memory_space<vmem>>, %arg15: memref<1x1x32xf32, #tpu.memory_space<vmem>>, %arg16: memref<1x32x64xbf16, #tpu.memory_space<vmem>>, %arg17: memref<1x1x64xf32, #tpu.memory_space<vmem>>, %arg18: memref<1x64x32xbf16, #tpu.memory_space<vmem>>, %arg19: memref<1x1x32xf32, #tpu.memory_space<vmem>>, %arg20: memref<1x1x32xf32, #tpu.memory_space<vmem>>, %arg21: memref<1x1x32xf32, #tpu.memory_space<vmem>>, %arg22: memref<1x8x32xf32, #tpu.memory_space<vmem>>) attributes {dimension_semantics = [#tpu.dimension_semantics<parallel>, #tpu.dimension_semantics<arbitrary>], iteration_bounds = array<i64: 2, 2>, scalar_prefetch = 0 : i64, scratch_operands = 0 : i64, tpu.core_type = #tpu.core_type<tc>, window_params = [{transform_indices = @transform_0, window_bounds = array<i64: 1, 8, 32>}, {transform_indices = @transform_1, window_bounds = array<i64: 1, 1, 8>}, {pipeline_mode = #tpu.pipeline_mode<synchronous>, transform_indices = @transform_2, window_bounds = array<i64: 1, 32>}, {pipeline_mode = #tpu.pipeline_mode<synchronous>, transform_indices = @transform_3, window_bounds = array<i64: 1, 32>}, {transform_indices = @transform_4, window_bounds = array<i64: 1, 32, 32>}, {transform_indices = @transform_5, window_bounds = array<i64: 1, 1, 32>}, {transform_indices = @transform_6, window_bounds = array<i64: 1, 32, 32>}, {transform_indices = @transform_7, window_bounds = array<i64: 1, 1, 32>}, {transform_indices = @transform_8, window_bounds = array<i64: 1, 32, 32>}, {transform_indices = @transform_9, window_bounds = array<i64: 1, 1, 32>}, {transform_indices = @transform_10, window_bounds = array<i64: 1, 32, 32>}, {transform_indices = @transform_11, window_bounds = array<i64: 1, 1, 32>}, {transform_indices = @transform_12, window_bounds = array<i64: 1, 1, 32>}, {transform_indices = @transform_13, window_bounds = array<i64: 1, 1, 32>}, {transform_indices = @transform_14, window_bounds = array<i64: 1, 32, 64>}, {transform_indices = @transform_15, window_bounds = array<i64: 1, 1, 64>}, {transform_indices = @transform_16, window_bounds = array<i64: 1, 64, 32>}, {transform_indices = @transform_17, window_bounds = array<i64: 1, 1, 32>}, {transform_indices = @transform_18, window_bounds = array<i64: 1, 1, 32>}, {transform_indices = @transform_19, window_bounds = array<i64: 1, 1, 32>}, {transform_indices = @transform_20, window_bounds = array<i64: 1, 8, 32>}]} {
    %c0_i32 = arith.constant 0 : i32
    %0 = arith.cmpi eq, %arg1, %c0_i32 : i32
    %1 = arith.extui %0 : i1 to i32
    %c0_i32_0 = arith.constant 0 : i32
    %2 = arith.cmpi ne, %1, %c0_i32_0 : i32
    scf.if %2 {
      %c0_83 = arith.constant 0 : index
      %c0_84 = arith.constant 0 : index
      %c0_85 = arith.constant 0 : index
      %173 = vector.load %arg2[%c0_83, %c0_84, %c0_85] : memref<1x8x32xf32, #tpu.memory_space<vmem>>, vector<1x8x32xf32>
      %174 = vector.shape_cast %173 : vector<1x8x32xf32> to vector<8x32xf32>
      %c0_86 = arith.constant 0 : index
      %c0_87 = arith.constant 0 : index
      %175 = vector.load %arg4[%c0_86, %c0_87] : memref<1x32xf32, #tpu.memory_space<vmem>>, vector<1x32xf32>
      %c0_88 = arith.constant 0 : index
      %c0_89 = arith.constant 0 : index
      %176 = vector.load %arg5[%c0_88, %c0_89] : memref<1x32xf32, #tpu.memory_space<vmem>>, vector<1x32xf32>
      %cst_90 = arith.constant dense<0.000000e+00> : vector<8xf32>
      %177 = vector.multi_reduction <add>, %174, %cst_90 [1] : vector<8x32xf32> to vector<8xf32>
      %178 = vector.shape_cast %177 : vector<8xf32> to vector<8x1xf32>
      %cst_91 = arith.constant 3.200000e+01 : f32
      %179 = vector.broadcast %cst_91 : f32 to vector<8x1xf32>
      %180 = arith.divf %178, %179 : vector<8x1xf32>
      %181 = vector.broadcast %180 : vector<8x1xf32> to vector<8x32xf32>
      %182 = arith.subf %174, %181 : vector<8x32xf32>
      %183 = arith.mulf %182, %182 : vector<8x32xf32>
      %cst_92 = arith.constant dense<0.000000e+00> : vector<8xf32>
      %184 = vector.multi_reduction <add>, %183, %cst_92 [1] : vector<8x32xf32> to vector<8xf32>
      %185 = vector.shape_cast %184 : vector<8xf32> to vector<8x1xf32>
      %cst_93 = arith.constant 3.200000e+01 : f32
      %186 = vector.broadcast %cst_93 : f32 to vector<8x1xf32>
      %187 = arith.divf %185, %186 : vector<8x1xf32>
      %188 = vector.broadcast %180 : vector<8x1xf32> to vector<8x32xf32>
      %189 = arith.subf %174, %188 : vector<8x32xf32>
      %cst_94 = arith.constant 9.99999996E-13 : f32
      %190 = vector.broadcast %cst_94 : f32 to vector<8x1xf32>
      %191 = arith.addf %187, %190 : vector<8x1xf32>
      %192 = math.rsqrt %191 : vector<8x1xf32>
      %193 = vector.broadcast %192 : vector<8x1xf32> to vector<8x32xf32>
      %194 = arith.mulf %189, %193 : vector<8x32xf32>
      %195 = vector.broadcast %175 : vector<1x32xf32> to vector<8x32xf32>
      %196 = arith.mulf %194, %195 : vector<8x32xf32>
      %197 = vector.broadcast %176 : vector<1x32xf32> to vector<8x32xf32>
      %198 = arith.addf %196, %197 : vector<8x32xf32>
      %c0_95 = arith.constant 0 : index
      %c0_96 = arith.constant 0 : index
      %c0_97 = arith.constant 0 : index
      %199 = vector.load %arg22[%c0_95, %c0_96, %c0_97] : memref<1x8x32xf32, #tpu.memory_space<vmem>>, vector<1x8x32xf32>
      %200 = vector.shape_cast %199 : vector<1x8x32xf32> to vector<8x32xf32>
      %201 = vector.shape_cast %198 : vector<8x32xf32> to vector<1x8x32xf32>
      tpu.vector_store %arg22[%c0_95, %c0_96, %c0_97], %201 {strides = array<i32>} : memref<1x8x32xf32, #tpu.memory_space<vmem>>, vector<1x8x32xf32>,
    } else {
    }
    %c0 = arith.constant 0 : index
    %c0_1 = arith.constant 0 : index
    %c0_2 = arith.constant 0 : index
    %3 = vector.load %arg22[%c0, %c0_1, %c0_2] : memref<1x8x32xf32, #tpu.memory_space<vmem>>, vector<1x8x32xf32>
    %4 = vector.shape_cast %3 : vector<1x8x32xf32> to vector<8x32xf32>
    %c0_3 = arith.constant 0 : index
    %c0_4 = arith.constant 0 : index
    %c0_5 = arith.constant 0 : index
    %5 = vector.load %arg3[%c0_3, %c0_4, %c0_5] : memref<1x1x8xf32, #tpu.memory_space<vmem>>, vector<1x1x8xf32>
    %6 = vector.shape_cast %5 : vector<1x1x8xf32> to vector<1x8xf32>
    %7 = arith.truncf %4 : vector<8x32xf32> to vector<8x32xbf16>
    %c0_6 = arith.constant 0 : index
    %c0_7 = arith.constant 0 : index
    %c0_8 = arith.constant 0 : index
    %8 = vector.load %arg6[%c0_6, %c0_7, %c0_8] : memref<1x32x32xbf16, #tpu.memory_space<vmem>>, vector<1x32x32xbf16>
    %9 = vector.shape_cast %8 : vector<1x32x32xbf16> to vector<32x32xbf16>
    %cst = arith.constant dense<0.000000e+00> : vector<8x32xf32>
    %10 = tpu.matmul %7, %9, %cst {dimension_numbers = #tpu.dot_dimension_numbers<[1], [0], [0], [1], [0, 0, 1, 1], [], []>} : vector<8x32xbf16>, vector<32x32xbf16>, vector<8x32xf32> -> vector<8x32xf32>
    %c0_9 = arith.constant 0 : index
    %c0_10 = arith.constant 0 : index
    %c0_11 = arith.constant 0 : index
    %11 = vector.load %arg7[%c0_9, %c0_10, %c0_11] : memref<1x1x32xf32, #tpu.memory_space<vmem>>, vector<1x1x32xf32>
    %12 = vector.shape_cast %11 : vector<1x1x32xf32> to vector<1x32xf32>
    %13 = vector.broadcast %12 : vector<1x32xf32> to vector<8x32xf32>
    %14 = arith.addf %10, %13 : vector<8x32xf32>
    %c0_12 = arith.constant 0 : index
    %c0_13 = arith.constant 0 : index
    %c0_14 = arith.constant 0 : index
    %15 = vector.load %arg8[%c0_12, %c0_13, %c0_14] : memref<1x32x32xbf16, #tpu.memory_space<vmem>>, vector<1x32x32xbf16>
    %16 = vector.shape_cast %15 : vector<1x32x32xbf16> to vector<32x32xbf16>
    %cst_15 = arith.constant dense<0.000000e+00> : vector<8x32xf32>
    %17 = tpu.matmul %7, %16, %cst_15 {dimension_numbers = #tpu.dot_dimension_numbers<[1], [0], [0], [1], [0, 0, 1, 1], [], []>} : vector<8x32xbf16>, vector<32x32xbf16>, vector<8x32xf32> -> vector<8x32xf32>
    %c0_16 = arith.constant 0 : index
    %c0_17 = arith.constant 0 : index
    %c0_18 = arith.constant 0 : index
    %18 = vector.load %arg9[%c0_16, %c0_17, %c0_18] : memref<1x1x32xf32, #tpu.memory_space<vmem>>, vector<1x1x32xf32>
    %19 = vector.shape_cast %18 : vector<1x1x32xf32> to vector<1x32xf32>
    %20 = vector.broadcast %19 : vector<1x32xf32> to vector<8x32xf32>
    %21 = arith.addf %17, %20 : vector<8x32xf32>
    %c0_19 = arith.constant 0 : index
    %c0_20 = arith.constant 0 : index
    %c0_21 = arith.constant 0 : index
    %22 = vector.load %arg10[%c0_19, %c0_20, %c0_21] : memref<1x32x32xbf16, #tpu.memory_space<vmem>>, vector<1x32x32xbf16>
    %23 = vector.shape_cast %22 : vector<1x32x32xbf16> to vector<32x32xbf16>
    %cst_22 = arith.constant dense<0.000000e+00> : vector<8x32xf32>
    %24 = tpu.matmul %7, %23, %cst_22 {dimension_numbers = #tpu.dot_dimension_numbers<[1], [0], [0], [1], [0, 0, 1, 1], [], []>} : vector<8x32xbf16>, vector<32x32xbf16>, vector<8x32xf32> -> vector<8x32xf32>
    %c0_23 = arith.constant 0 : index
    %c0_24 = arith.constant 0 : index
    %c0_25 = arith.constant 0 : index
    %25 = vector.load %arg11[%c0_23, %c0_24, %c0_25] : memref<1x1x32xf32, #tpu.memory_space<vmem>>, vector<1x1x32xf32>
    %26 = vector.shape_cast %25 : vector<1x1x32xf32> to vector<1x32xf32>
    %27 = vector.broadcast %26 : vector<1x32xf32> to vector<8x32xf32>
    %28 = arith.addf %24, %27 : vector<8x32xf32>
    %29 = arith.truncf %14 : vector<8x32xf32> to vector<8x32xbf16>
    %30 = vector.extract_strided_slice %29 {offsets = [0, 0], sizes = [8, 16], strides = [1, 1]} : vector<8x32xbf16> to vector<8x16xbf16>
    %31 = vector.shape_cast %30 : vector<8x16xbf16> to vector<1x8x16xbf16>
    %32 = vector.extract_strided_slice %29 {offsets = [0, 16], sizes = [8, 16], strides = [1, 1]} : vector<8x32xbf16> to vector<8x16xbf16>
    %33 = vector.shape_cast %32 : vector<8x16xbf16> to vector<1x8x16xbf16>
    %34 = tpu.concatenate %31, %33 in 0 : vector<1x8x16xbf16>, vector<1x8x16xbf16> -> vector<2x8x16xbf16>
    %35 = arith.truncf %21 : vector<8x32xf32> to vector<8x32xbf16>
    %36 = vector.extract_strided_slice %35 {offsets = [0, 0], sizes = [8, 16], strides = [1, 1]} : vector<8x32xbf16> to vector<8x16xbf16>
    %37 = vector.shape_cast %36 : vector<8x16xbf16> to vector<1x8x16xbf16>
    %38 = vector.extract_strided_slice %35 {offsets = [0, 16], sizes = [8, 16], strides = [1, 1]} : vector<8x32xbf16> to vector<8x16xbf16>
    %39 = vector.shape_cast %38 : vector<8x16xbf16> to vector<1x8x16xbf16>
    %40 = tpu.concatenate %37, %39 in 0 : vector<1x8x16xbf16>, vector<1x8x16xbf16> -> vector<2x8x16xbf16>
    %41 = arith.truncf %28 : vector<8x32xf32> to vector<8x32xbf16>
    %42 = vector.extract_strided_slice %41 {offsets = [0, 0], sizes = [8, 16], strides = [1, 1]} : vector<8x32xbf16> to vector<8x16xbf16>
    %43 = vector.shape_cast %42 : vector<8x16xbf16> to vector<1x8x16xbf16>
    %44 = vector.extract_strided_slice %41 {offsets = [0, 16], sizes = [8, 16], strides = [1, 1]} : vector<8x32xbf16> to vector<8x16xbf16>
    %45 = vector.shape_cast %44 : vector<8x16xbf16> to vector<1x8x16xbf16>
    %46 = tpu.concatenate %43, %45 in 0 : vector<1x8x16xbf16>, vector<1x8x16xbf16> -> vector<2x8x16xbf16>
    %cst_26 = arith.constant 0xFF800000 : f32
    %47 = vector.broadcast %cst_26 : f32 to vector<2x8x1xf32>
    %cst_27 = arith.constant 0.000000e+00 : f32
    %48 = vector.broadcast %cst_27 : f32 to vector<2x8x1xf32>
    %cst_28 = arith.constant 0.000000e+00 : f32
    %49 = vector.broadcast %cst_28 : f32 to vector<2x8x16xf32>
    "tpu.trace_start"() <{level = 10 : i32, message = "nqd,nkd->nqk"}> : () -> ()
    %cst_29 = arith.constant dense<0.000000e+00> : vector<2x8x8xf32>
    %50 = tpu.matmul %34, %40, %cst_29 {dimension_numbers = #tpu.dot_dimension_numbers<[2], [2], [1], [1], [0, 0, 0, 1, 1, 1], [0], [0]>} : vector<2x8x16xbf16>, vector<2x8x16xbf16>, vector<2x8x8xf32> -> vector<2x8x8xf32>
    "tpu.trace_stop"() : () -> ()
    %51 = vector.shape_cast %6 : vector<1x8xf32> to vector<1x1x8xf32>
    %52 = vector.broadcast %51 : vector<1x1x8xf32> to vector<2x8x8xf32>
    %53 = arith.addf %50, %52 : vector<2x8x8xf32>
    %cst_30 = arith.constant dense<0xFF800000> : vector<2x8xf32>
    %54 = vector.multi_reduction <maximumf>, %53, %cst_30 [2] : vector<2x8x8xf32> to vector<2x8xf32>
    %55 = vector.shape_cast %54 : vector<2x8xf32> to vector<2x8x1xf32>
    %56 = arith.maximumf %47, %55 : vector<2x8x1xf32>
    %57 = arith.subf %47, %56 : vector<2x8x1xf32>
    %58 = math.exp %57 : vector<2x8x1xf32>
    %59 = vector.broadcast %56 : vector<2x8x1xf32> to vector<2x8x8xf32>
    %60 = arith.subf %53, %59 : vector<2x8x8xf32>
    %61 = math.exp %60 : vector<2x8x8xf32>
    %62 = arith.mulf %58, %48 : vector<2x8x1xf32>
    %cst_31 = arith.constant dense<0.000000e+00> : vector<2x8xf32>
    %63 = vector.multi_reduction <add>, %61, %cst_31 [2] : vector<2x8x8xf32> to vector<2x8xf32>
    %64 = vector.shape_cast %63 : vector<2x8xf32> to vector<2x8x1xf32>
    %65 = arith.addf %62, %64 : vector<2x8x1xf32>
    %66 = vector.broadcast %58 : vector<2x8x1xf32> to vector<2x8x16xf32>
    %67 = arith.mulf %66, %49 : vector<2x8x16xf32>
    %68 = arith.truncf %61 : vector<2x8x8xf32> to vector<2x8x8xbf16>
    "tpu.trace_start"() <{level = 10 : i32, message = "nqk,nkd->nqd"}> : () -> ()
    %cst_32 = arith.constant dense<0.000000e+00> : vector<2x8x16xf32>
    %69 = tpu.matmul %68, %46, %cst_32 {dimension_numbers = #tpu.dot_dimension_numbers<[2], [1], [1], [2], [0, 0, 0, 1, 1, 2], [0], [0]>} : vector<2x8x8xbf16>, vector<2x8x16xbf16>, vector<2x8x16xf32> -> vector<2x8x16xf32>
    "tpu.trace_stop"() : () -> ()
    %70 = arith.addf %67, %69 : vector<2x8x16xf32>
    %71 = tpu.reciprocal %65 {approx = true} : vector<2x8x1xf32> -> vector<2x8x1xf32>
    %72 = vector.broadcast %71 : vector<2x8x1xf32> to vector<2x8x16xf32>
    %73 = arith.mulf %70, %72 : vector<2x8x16xf32>
    %74 = arith.truncf %73 : vector<2x8x16xf32> to vector<2x8x16xbf16>
    %75 = vector.extract_strided_slice %74 {offsets = [0, 0, 0], sizes = [1, 8, 16], strides = [1, 1, 1]} : vector<2x8x16xbf16> to vector<1x8x16xbf16>
    %76 = vector.shape_cast %75 : vector<1x8x16xbf16> to vector<8x16xbf16>
    %77 = vector.extract_strided_slice %74 {offsets = [1, 0, 0], sizes = [1, 8, 16], strides = [1, 1, 1]} : vector<2x8x16xbf16> to vector<1x8x16xbf16>
    %78 = vector.shape_cast %77 : vector<1x8x16xbf16> to vector<8x16xbf16>
    %79 = tpu.concatenate %76, %78 in 1 : vector<8x16xbf16>, vector<8x16xbf16> -> vector<8x32xbf16>
    %c0_33 = arith.constant 0 : index
    %c0_34 = arith.constant 0 : index
    %c0_35 = arith.constant 0 : index
    %80 = vector.load %arg12[%c0_33, %c0_34, %c0_35] : memref<1x32x32xbf16, #tpu.memory_space<vmem>>, vector<1x32x32xbf16>
    %81 = vector.shape_cast %80 : vector<1x32x32xbf16> to vector<32x32xbf16>
    %cst_36 = arith.constant dense<0.000000e+00> : vector<8x32xf32>
    %82 = tpu.matmul %79, %81, %cst_36 {dimension_numbers = #tpu.dot_dimension_numbers<[1], [0], [0], [1], [0, 0, 1, 1], [], []>} : vector<8x32xbf16>, vector<32x32xbf16>, vector<8x32xf32> -> vector<8x32xf32>
    %c0_37 = arith.constant 0 : index
    %c0_38 = arith.constant 0 : index
    %c0_39 = arith.constant 0 : index
    %83 = vector.load %arg13[%c0_37, %c0_38, %c0_39] : memref<1x1x32xf32, #tpu.memory_space<vmem>>, vector<1x1x32xf32>
    %84 = vector.shape_cast %83 : vector<1x1x32xf32> to vector<1x32xf32>
    %85 = vector.broadcast %84 : vector<1x32xf32> to vector<8x32xf32>
    %86 = arith.addf %82, %85 : vector<8x32xf32>
    %87 = arith.addf %4, %86 : vector<8x32xf32>
    %c0_40 = arith.constant 0 : index
    %c0_41 = arith.constant 0 : index
    %c0_42 = arith.constant 0 : index
    %88 = vector.load %arg14[%c0_40, %c0_41, %c0_42] : memref<1x1x32xf32, #tpu.memory_space<vmem>>, vector<1x1x32xf32>
    %89 = vector.shape_cast %88 : vector<1x1x32xf32> to vector<1x32xf32>
    %c0_43 = arith.constant 0 : index
    %c0_44 = arith.constant 0 : index
    %c0_45 = arith.constant 0 : index
    %90 = vector.load %arg15[%c0_43, %c0_44, %c0_45] : memref<1x1x32xf32, #tpu.memory_space<vmem>>, vector<1x1x32xf32>
    %91 = vector.shape_cast %90 : vector<1x1x32xf32> to vector<1x32xf32>
    %cst_46 = arith.constant dense<0.000000e+00> : vector<8xf32>
    %92 = vector.multi_reduction <add>, %87, %cst_46 [1] : vector<8x32xf32> to vector<8xf32>
    %93 = vector.shape_cast %92 : vector<8xf32> to vector<8x1xf32>
    %cst_47 = arith.constant 3.200000e+01 : f32
    %94 = vector.broadcast %cst_47 : f32 to vector<8x1xf32>
    %95 = arith.divf %93, %94 : vector<8x1xf32>
    %96 = vector.broadcast %95 : vector<8x1xf32> to vector<8x32xf32>
    %97 = arith.subf %87, %96 : vector<8x32xf32>
    %98 = arith.mulf %97, %97 : vector<8x32xf32>
    %cst_48 = arith.constant dense<0.000000e+00> : vector<8xf32>
    %99 = vector.multi_reduction <add>, %98, %cst_48 [1] : vector<8x32xf32> to vector<8xf32>
    %100 = vector.shape_cast %99 : vector<8xf32> to vector<8x1xf32>
    %cst_49 = arith.constant 3.200000e+01 : f32
    %101 = vector.broadcast %cst_49 : f32 to vector<8x1xf32>
    %102 = arith.divf %100, %101 : vector<8x1xf32>
    %103 = vector.broadcast %95 : vector<8x1xf32> to vector<8x32xf32>
    %104 = arith.subf %87, %103 : vector<8x32xf32>
    %cst_50 = arith.constant 9.99999996E-13 : f32
    %105 = vector.broadcast %cst_50 : f32 to vector<8x1xf32>
    %106 = arith.addf %102, %105 : vector<8x1xf32>
    %107 = math.rsqrt %106 : vector<8x1xf32>
    %108 = vector.broadcast %107 : vector<8x1xf32> to vector<8x32xf32>
    %109 = arith.mulf %104, %108 : vector<8x32xf32>
    %110 = vector.broadcast %89 : vector<1x32xf32> to vector<8x32xf32>
    %111 = arith.mulf %109, %110 : vector<8x32xf32>
    %112 = vector.broadcast %91 : vector<1x32xf32> to vector<8x32xf32>
    %113 = arith.addf %111, %112 : vector<8x32xf32>
    %114 = arith.truncf %113 : vector<8x32xf32> to vector<8x32xbf16>
    %c0_51 = arith.constant 0 : index
    %c0_52 = arith.constant 0 : index
    %c0_53 = arith.constant 0 : index
    %115 = vector.load %arg16[%c0_51, %c0_52, %c0_53] : memref<1x32x64xbf16, #tpu.memory_space<vmem>>, vector<1x32x64xbf16>
    %116 = vector.shape_cast %115 : vector<1x32x64xbf16> to vector<32x64xbf16>
    %cst_54 = arith.constant dense<0.000000e+00> : vector<8x64xf32>
    %117 = tpu.matmul %114, %116, %cst_54 {dimension_numbers = #tpu.dot_dimension_numbers<[1], [0], [0], [1], [0, 0, 1, 1], [], []>} : vector<8x32xbf16>, vector<32x64xbf16>, vector<8x64xf32> -> vector<8x64xf32>
    %c0_55 = arith.constant 0 : index
    %c0_56 = arith.constant 0 : index
    %c0_57 = arith.constant 0 : index
    %118 = vector.load %arg17[%c0_55, %c0_56, %c0_57] : memref<1x1x64xf32, #tpu.memory_space<vmem>>, vector<1x1x64xf32>
    %119 = vector.shape_cast %118 : vector<1x1x64xf32> to vector<1x64xf32>
    %120 = vector.broadcast %119 : vector<1x64xf32> to vector<8x64xf32>
    %121 = arith.addf %117, %120 : vector<8x64xf32>
    %cst_58 = arith.constant 5.000000e-01 : f32
    %122 = vector.broadcast %cst_58 : f32 to vector<8x64xf32>
    %123 = arith.mulf %122, %121 : vector<8x64xf32>
    %cst_59 = arith.constant 4.471500e-02 : f32
    %124 = vector.broadcast %cst_59 : f32 to vector<8x64xf32>
    %125 = arith.mulf %124, %121 : vector<8x64xf32>
    %126 = arith.mulf %125, %121 : vector<8x64xf32>
    %127 = arith.mulf %126, %121 : vector<8x64xf32>
    %128 = arith.addf %121, %127 : vector<8x64xf32>
    %cst_60 = arith.constant 0.797884583 : f32
    %129 = vector.broadcast %cst_60 : f32 to vector<8x64xf32>
    %130 = arith.mulf %129, %128 : vector<8x64xf32>
    %131 = math.tanh %130 : vector<8x64xf32>
    %cst_61 = arith.constant 1.000000e+00 : f32
    %132 = vector.broadcast %cst_61 : f32 to vector<8x64xf32>
    %133 = arith.addf %132, %131 : vector<8x64xf32>
    %134 = arith.mulf %123, %133 : vector<8x64xf32>
    %135 = arith.truncf %134 : vector<8x64xf32> to vector<8x64xbf16>
    %c0_62 = arith.constant 0 : index
    %c0_63 = arith.constant 0 : index
    %c0_64 = arith.constant 0 : index
    %136 = vector.load %arg18[%c0_62, %c0_63, %c0_64] : memref<1x64x32xbf16, #tpu.memory_space<vmem>>, vector<1x64x32xbf16>
    %137 = vector.shape_cast %136 : vector<1x64x32xbf16> to vector<64x32xbf16>
    %cst_65 = arith.constant dense<0.000000e+00> : vector<8x32xf32>
    %138 = tpu.matmul %135, %137, %cst_65 {dimension_numbers = #tpu.dot_dimension_numbers<[1], [0], [0], [1], [0, 0, 1, 1], [], []>} : vector<8x64xbf16>, vector<64x32xbf16>, vector<8x32xf32> -> vector<8x32xf32>
    %c0_66 = arith.constant 0 : index
    %c0_67 = arith.constant 0 : index
    %c0_68 = arith.constant 0 : index
    %139 = vector.load %arg19[%c0_66, %c0_67, %c0_68] : memref<1x1x32xf32, #tpu.memory_space<vmem>>, vector<1x1x32xf32>
    %140 = vector.shape_cast %139 : vector<1x1x32xf32> to vector<1x32xf32>
    %141 = vector.broadcast %140 : vector<1x32xf32> to vector<8x32xf32>
    %142 = arith.addf %138, %141 : vector<8x32xf32>
    %143 = arith.addf %113, %142 : vector<8x32xf32>
    %c0_69 = arith.constant 0 : index
    %c0_70 = arith.constant 0 : index
    %c0_71 = arith.constant 0 : index
    %144 = vector.load %arg20[%c0_69, %c0_70, %c0_71] : memref<1x1x32xf32, #tpu.memory_space<vmem>>, vector<1x1x32xf32>
    %145 = vector.shape_cast %144 : vector<1x1x32xf32> to vector<1x32xf32>
    %c0_72 = arith.constant 0 : index
    %c0_73 = arith.constant 0 : index
    %c0_74 = arith.constant 0 : index
    %146 = vector.load %arg21[%c0_72, %c0_73, %c0_74] : memref<1x1x32xf32, #tpu.memory_space<vmem>>, vector<1x1x32xf32>
    %147 = vector.shape_cast %146 : vector<1x1x32xf32> to vector<1x32xf32>
    %cst_75 = arith.constant dense<0.000000e+00> : vector<8xf32>
    %148 = vector.multi_reduction <add>, %143, %cst_75 [1] : vector<8x32xf32> to vector<8xf32>
    %149 = vector.shape_cast %148 : vector<8xf32> to vector<8x1xf32>
    %cst_76 = arith.constant 3.200000e+01 : f32
    %150 = vector.broadcast %cst_76 : f32 to vector<8x1xf32>
    %151 = arith.divf %149, %150 : vector<8x1xf32>
    %152 = vector.broadcast %151 : vector<8x1xf32> to vector<8x32xf32>
    %153 = arith.subf %143, %152 : vector<8x32xf32>
    %154 = arith.mulf %153, %153 : vector<8x32xf32>
    %cst_77 = arith.constant dense<0.000000e+00> : vector<8xf32>
    %155 = vector.multi_reduction <add>, %154, %cst_77 [1] : vector<8x32xf32> to vector<8xf32>
    %156 = vector.shape_cast %155 : vector<8xf32> to vector<8x1xf32>
    %cst_78 = arith.constant 3.200000e+01 : f32
    %157 = vector.broadcast %cst_78 : f32 to vector<8x1xf32>
    %158 = arith.divf %156, %157 : vector<8x1xf32>
    %159 = vector.broadcast %151 : vector<8x1xf32> to vector<8x32xf32>
    %160 = arith.subf %143, %159 : vector<8x32xf32>
    %cst_79 = arith.constant 9.99999996E-13 : f32
    %161 = vector.broadcast %cst_79 : f32 to vector<8x1xf32>
    %162 = arith.addf %158, %161 : vector<8x1xf32>
    %163 = math.rsqrt %162 : vector<8x1xf32>
    %164 = vector.broadcast %163 : vector<8x1xf32> to vector<8x32xf32>
    %165 = arith.mulf %160, %164 : vector<8x32xf32>
    %166 = vector.broadcast %145 : vector<1x32xf32> to vector<8x32xf32>
    %167 = arith.mulf %165, %166 : vector<8x32xf32>
    %168 = vector.broadcast %147 : vector<1x32xf32> to vector<8x32xf32>
    %169 = arith.addf %167, %168 : vector<8x32xf32>
    %c0_80 = arith.constant 0 : index
    %c0_81 = arith.constant 0 : index
    %c0_82 = arith.constant 0 : index
    %170 = vector.load %arg22[%c0_80, %c0_81, %c0_82] : memref<1x8x32xf32, #tpu.memory_space<vmem>>, vector<1x8x32xf32>
    %171 = vector.shape_cast %170 : vector<1x8x32xf32> to vector<8x32xf32>
    %172 = vector.shape_cast %169 : vector<8x32xf32> to vector<1x8x32xf32>
    tpu.vector_store %arg22[%c0_80, %c0_81, %c0_82], %172 {strides = array<i32>} : memref<1x8x32xf32, #tpu.memory_space<vmem>>, vector<1x8x32xf32>,
    return
  }
  func.func @transform_0(%arg0: i32, %arg1: i32) -> (i32, i32, i32) {
    %c0_i32 = arith.constant 0 : i32
    %c0_i32_0 = arith.constant 0 : i32
    %c0_i32_1 = arith.constant 0 : i32
    return %arg0, %c0_i32, %c0_i32_0 : i32, i32, i32
  }
  func.func @transform_1(%arg0: i32, %arg1: i32) -> (i32, i32, i32) {
    %c0_i32 = arith.constant 0 : i32
    %c0_i32_0 = arith.constant 0 : i32
    %c0_i32_1 = arith.constant 0 : i32
    return %arg0, %c0_i32, %c0_i32_0 : i32, i32, i32
  }
  func.func @transform_2(%arg0: i32, %arg1: i32) -> (i32, i32) {
    %c0_i32 = arith.constant 0 : i32
    %c0_i32_0 = arith.constant 0 : i32
    %c0_i32_1 = arith.constant 0 : i32
    return %c0_i32, %c0_i32_0 : i32, i32
  }
  func.func @transform_3(%arg0: i32, %arg1: i32) -> (i32, i32) {
    %c0_i32 = arith.constant 0 : i32
    %c0_i32_0 = arith.constant 0 : i32
    %c0_i32_1 = arith.constant 0 : i32
    return %c0_i32, %c0_i32_0 : i32, i32
  }
  func.func @transform_4(%arg0: i32, %arg1: i32) -> (i32, i32, i32) {
    %c0_i32 = arith.constant 0 : i32
    %c0_i32_0 = arith.constant 0 : i32
    %c0_i32_1 = arith.constant 0 : i32
    return %arg1, %c0_i32, %c0_i32_0 : i32, i32, i32
  }
  func.func @transform_5(%arg0: i32, %arg1: i32) -> (i32, i32, i32) {
    %c0_i32 = arith.constant 0 : i32
    %c0_i32_0 = arith.constant 0 : i32
    %c0_i32_1 = arith.constant 0 : i32
    return %arg1, %c0_i32, %c0_i32_0 : i32, i32, i32
  }
  func.func @transform_6(%arg0: i32, %arg1: i32) -> (i32, i32, i32) {
    %c0_i32 = arith.constant 0 : i32
    %c0_i32_0 = arith.constant 0 : i32
    %c0_i32_1 = arith.constant 0 : i32
    return %arg1, %c0_i32, %c0_i32_0 : i32, i32, i32
  }
  func.func @transform_7(%arg0: i32, %arg1: i32) -> (i32, i32, i32) {
    %c0_i32 = arith.constant 0 : i32
    %c0_i32_0 = arith.constant 0 : i32
    %c0_i32_1 = arith.constant 0 : i32
    return %arg1, %c0_i32, %c0_i32_0 : i32, i32, i32
  }
  func.func @transform_8(%arg0: i32, %arg1: i32) -> (i32, i32, i32) {
    %c0_i32 = arith.constant 0 : i32
    %c0_i32_0 = arith.constant 0 : i32
    %c0_i32_1 = arith.constant 0 : i32
    return %arg1, %c0_i32, %c0_i32_0 : i32, i32, i32
  }
  func.func @transform_9(%arg0: i32, %arg1: i32) -> (i32, i32, i32) {
    %c0_i32 = arith.constant 0 : i32
    %c0_i32_0 = arith.constant 0 : i32
    %c0_i32_1 = arith.constant 0 : i32
    return %arg1, %c0_i32, %c0_i32_0 : i32, i32, i32
  }
  func.func @transform_10(%arg0: i32, %arg1: i32) -> (i32, i32, i32) {
    %c0_i32 = arith.constant 0 : i32
    %c0_i32_0 = arith.constant 0 : i32
    %c0_i32_1 = arith.constant 0 : i32
    return %arg1, %c0_i32, %c0_i32_0 : i32, i32, i32
  }
  func.func @transform_11(%arg0: i32, %arg1: i32) -> (i32, i32, i32) {
    %c0_i32 = arith.constant 0 : i32
    %c0_i32_0 = arith.constant 0 : i32
    %c0_i32_1 = arith.constant 0 : i32
    return %arg1, %c0_i32, %c0_i32_0 : i32, i32, i32
  }
  func.func @transform_12(%arg0: i32, %arg1: i32) -> (i32, i32, i32) {
    %c0_i32 = arith.constant 0 : i32
    %c0_i32_0 = arith.constant 0 : i32
    %c0_i32_1 = arith.constant 0 : i32
    return %arg1, %c0_i32, %c0_i32_0 : i32, i32, i32
  }
  func.func @transform_13(%arg0: i32, %arg1: i32) -> (i32, i32, i32) {
    %c0_i32 = arith.constant 0 : i32
    %c0_i32_0 = arith.constant 0 : i32
    %c0_i32_1 = arith.constant 0 : i32
    return %arg1, %c0_i32, %c0_i32_0 : i32, i32, i32
  }
  func.func @transform_14(%arg0: i32, %arg1: i32) -> (i32, i32, i32) {
    %c0_i32 = arith.constant 0 : i32
    %c0_i32_0 = arith.constant 0 : i32
    %c0_i32_1 = arith.constant 0 : i32
    return %arg1, %c0_i32, %c0_i32_0 : i32, i32, i32
  }
  func.func @transform_15(%arg0: i32, %arg1: i32) -> (i32, i32, i32) {
    %c0_i32 = arith.constant 0 : i32
    %c0_i32_0 = arith.constant 0 : i32
    %c0_i32_1 = arith.constant 0 : i32
    return %arg1, %c0_i32, %c0_i32_0 : i32, i32, i32
  }
  func.func @transform_16(%arg0: i32, %arg1: i32) -> (i32, i32, i32) {
    %c0_i32 = arith.constant 0 : i32
    %c0_i32_0 = arith.constant 0 : i32
    %c0_i32_1 = arith.constant 0 : i32
    return %arg1, %c0_i32, %c0_i32_0 : i32, i32, i32
  }
  func.func @transform_17(%arg0: i32, %arg1: i32) -> (i32, i32, i32) {
    %c0_i32 = arith.constant 0 : i32
    %c0_i32_0 = arith.constant 0 : i32
    %c0_i32_1 = arith.constant 0 : i32
    return %arg1, %c0_i32, %c0_i32_0 : i32, i32, i32
  }
  func.func @transform_18(%arg0: i32, %arg1: i32) -> (i32, i32, i32) {
    %c0_i32 = arith.constant 0 : i32
    %c0_i32_0 = arith.constant 0 : i32
    %c0_i32_1 = arith.constant 0 : i32
    return %arg1, %c0_i32, %c0_i32_0 : i32, i32, i32
  }
  func.func @transform_19(%arg0: i32, %arg1: i32) -> (i32, i32, i32) {
    %c0_i32 = arith.constant 0 : i32
    %c0_i32_0 = arith.constant 0 : i32
    %c0_i32_1 = arith.constant 0 : i32
    return %arg1, %c0_i32, %c0_i32_0 : i32, i32, i32
  }
  func.func @transform_20(%arg0: i32, %arg1: i32) -> (i32, i32, i32) {
    %c0_i32 = arith.constant 0 : i32
    %c0_i32_0 = arith.constant 0 : i32
    %c0_i32_1 = arith.constant 0 : i32
    return %arg0, %c0_i32, %c0_i32_0 : i32, i32, i32
  }
}

</mosaic_0001>

<bundles_post_ra>
// kernel: tpu_custom_call.1
= control target key start
LH: loop header
LB: loop body
LE: loop exit
PB: predicated region body
PF: predicated region fallthrough
CT: control target
= control target key end

     0   :  { %6 = vsyncpa [#allocation3], 0  ;;  %s373_s0 = inlined_call_operand.hbm [shape: bf16[8,32], index: 0, kind: input, shape index: {}]   ;;  %s374_s1 = inlined_call_operand.hbm [shape: bf16[8,32], index: 1, kind: output, shape index: {}]  }
   0x1   :  { %7 = vsyncpa [#allocation4], 0  ;;  %s332_s6 = smov [#allocation2]   ;;  %s284_s10 = scalar_lea.hbm %s373_s0, 64 }
   0x2   :  { %s14_s7 = sshll.u32 %s332_s6, 4  ;;  %p285_p0 = scmp.ne.s32.totalorder %s373_s0, %s284_s10  ;;  %s15_s7 = int_to_ptr.vmem [resolvable:$true] %s14_s7 }
   0x3   :  { %p288_p1 = scmp.lt.u32.totalorder %s284_s10, %s373_s0 }
   0x5   :  { %p290_p2 = pnand %p288_p1, %p285_p0 }
   0x7   :  { %293 = shalt.err (!%p290_p2)
}
   0x8   :  { %s294_s15 = scalar_lea.vmem %s15_s7, 64  ;;  %p299_p4 = scmp.lt.s32.totalorder %s15_s7, %s15_s7 }
   0x9   :  { %p295_p3 = scmp.ne.s32.totalorder %s15_s7, %s294_s15  ;;  %p300_p5 = scmp.lt.s32.totalorder %s294_s15, %s294_s15 }
   0xb   :  { %p301_p6 = por %p300_p5, %p299_p4 }
   0xd   :  { %p302_p7 = pnand %p301_p6, %p295_p3 }
   0xf   :  { %305 = shalt.err (!%p302_p7)
}
  0x10   :  { %17 = dma.hbm_to_vmem [thread:$0]  %s373_s0, 64, %s15_s7, [#allocation3]  }
  0x11   :  { %328 = dma.done.wait [#allocation3], 64  }
  0x12   :  { %329 = vsyncadd [#allocation3], 4294967232  ;;  %v22_v0 = vld [vmem:[#allocation2] sm:$0xf]  ;;  %s333_s18 = smov 112   ;;  %v36_v3 = vlaneseq  ;;  %v336_v17 = vmov 0  }
  0x13   :  { %24 = vrot.lane.b32.xlu0 %v22_v0, %s333_s18  ;;  %v334_v1 = vmov 1983009808   ;;  %v335_v6 = vmov 1934713408   ;;  %v29_v8 = vshrl.u32 %v22_v0, 16  ;;  %s337_s0 = smov 16  }
  0x14   :  { %v34_v2 = vunpack.c.l.s4 %v334_v1  ;;  %v37_v5 = vshrl.u32 %v36_v3, 7  ;;  %v42_v7 = vunpack.c.l.s4 %v335_v6  ;;  %s338_s19 = smov [#allocation5]   ;;  %vm250_vm0 = vcmask 130048  }
  0x15   :  { %s263_s20 = sshll.u32 %s338_s19, 4  ;;  %vm255_vm1 = vcmask 257024   ;;  %s264_s20 = int_to_ptr.vmem [resolvable:$true] %s263_s20 }
  0x16   :  { %v35_v4 = vunpack.c.0.s8 %v34_v2  ;;  %v43_v10 = vunpack.c.0.s8 %v42_v7  ;;  %s306_s21 = scalar_lea.vmem %s264_s20, 64  ;;  %p311_p9 = scmp.lt.s32.totalorder %s264_s20, %s264_s20 }
  0x17   :  { %p307_p8 = scmp.ne.s32.totalorder %s264_s20, %s306_s21  ;;  %p312_p10 = scmp.lt.s32.totalorder %s306_s21, %s306_s21 }
  0x18   :  { %v38_v9 = vsub.s32 %v35_v4, %v37_v5  ;;  %v46_v14 = vsub.s32 %v43_v10, %v37_v5 }
  0x19   :  { %p313_p11 = por %p312_p10, %p311_p9 }
  0x1b   :  { %p314_p12 = pnand %p313_p11, %p307_p8 }
  0x85   :  { %v25_v11 = vpop.permute.xlu0 %24 }
  0x86   :  { %v28_v12 = vpack.i.b16 %v25_v11, %v22_v0  ;;  %v30_v13 = vshrl.u32 %v25_v11, 16 }
  0x88   :  { %v31_v15 = vpack.i.b16 %v30_v13, %v29_v8  ;;  %v39_v16 = vrot.slane %v28_v12, %v38_v9 }
  0x8a   :  { %v40_v18 = vcombine.high %v39_v16, %v336_v17  ;;  %v64_v19 = vrot.slane %v31_v15, %v38_v9  ;;  %v47_v20 = vrot.slane %v39_v16, %v46_v14 }
  0x8c   :  { %v54_v21 = vrot.slane %v40_v18, %v46_v14  ;;  %v65_v22 = vcombine.high %v64_v19, %v336_v17  ;;  %v72_v23 = vrot.slane %v64_v19, %v46_v14 }
  0x8e   :  { %v79_v24 = vrot.slane %v65_v22, %v46_v14  ;;  %v82_v25 = vcombine.low %v47_v20, %v54_v21  ;;  %v272_v26 = vcombine.high %v47_v20, %v54_v21 }
  0x90   :  { %v89_v27 = vrot.slane %v82_v25, %v38_v9  ;;  %v97_v28 = vrot.slane %v272_v26, %v38_v9  ;;  %v106_v29 = vcombine.low %v72_v23, %v79_v24  ;;  %v273_v30 = vcombine.high %v72_v23, %v79_v24 }
  0x92   :  { %v98_v31 = vcombine.low %v89_v27, %v97_v28  ;;  %v113_v32 = vrot.slane %v106_v29, %v38_v9  ;;  %v121_v33 = vrot.slane %v273_v30, %v38_v9 }
  0x94   :  { %v105_v34 = vrot.slane %v98_v31, %v46_v14  ;;  %v122_v35 = vcombine.low %v113_v32, %v121_v33 }
  0x96   :  { %v129_v36 = vrot.slane %v122_v35, %v46_v14  ;;  %v133_v38 = vshrl.u32 %v105_v34, 16 }
  0x98   :  { %v132_v37 = vpack.i.b16 %v129_v36, %v105_v34  ;;  %v134_v39 = vshrl.u32 %v129_v36, 16 }
  0x9a   :  { %v135_v40 = vpack.i.b16 %v134_v39, %v133_v38  ;;  %v139_v42 = vshrl.u32 %v132_v37, 16 }
  0x9c   :  { %v138_v41 = vpack.i.b16 %v135_v40, %v132_v37  ;;  %v140_v43 = vshrl.u32 %v135_v40, 16 }
  0x9e   :  { %v141_v44 = vpack.i.b16 %v140_v43, %v139_v42  ;;  %v149_v45 = vrot.slane %v138_v41, %v38_v9 }
  0xa0   :  { %v150_v46 = vcombine.high %v149_v45, %v336_v17  ;;  %v174_v47 = vrot.slane %v141_v44, %v38_v9  ;;  %v157_v50 = vrot.slane %v149_v45, %v46_v14 }
  0xa2   :  { %v164_v48 = vrot.slane %v150_v46, %v46_v14  ;;  %v175_v49 = vcombine.high %v174_v47, %v336_v17  ;;  %v182_v52 = vrot.slane %v174_v47, %v46_v14 }
  0xa4   :  { %v189_v51 = vrot.slane %v175_v49, %v46_v14  ;;  %v192_v53 = vcombine.low %v157_v50, %v164_v48  ;;  %v274_v54 = vcombine.high %v157_v50, %v164_v48 }
  0xa6   :  { %v199_v55 = vrot.slane %v192_v53, %v38_v9  ;;  %v207_v56 = vrot.slane %v274_v54, %v38_v9  ;;  %v216_v57 = vcombine.low %v182_v52, %v189_v51  ;;  %v275_v58 = vcombine.high %v182_v52, %v189_v51 }
  0xa8   :  { %v208_v59 = vcombine.low %v199_v55, %v207_v56  ;;  %v223_v60 = vrot.slane %v216_v57, %v38_v9  ;;  %v231_v61 = vrot.slane %v275_v58, %v38_v9 }
  0xaa   :  { %v215_v62 = vrot.slane %v208_v59, %v46_v14  ;;  %v232_v63 = vcombine.low %v223_v60, %v231_v61 }
  0xac   :  { %v239_v0 = vrot.slane %v232_v63, %v46_v14  ;;  %v243_v1 = vshrl.u32 %v215_v62, 16 }
  0xae   :  { %v244_v2 = vshrl.u32 %v239_v0, 16  ;;  %v242_v3 = vpack.i.b16 %v239_v0, %v215_v62 }
  0xb0   :  { %v245_v4 = vpack.i.b16 %v244_v2, %v243_v1 }
  0xb2   :  { %v276_v5 = vcombine.low %v245_v4, %v245_v4 }
  0xb4   :  { %248 = vrot.lane.b32.xlu0 %v276_v5, %s337_s0 }
 0x126   :  { %v249_v6 = vpop.permute.xlu0 %248 }
 0x127   :  { %v253_v7 = vsel %vm250_vm0, %v242_v3, %v249_v6 }
 0x128   :  { %256 = vst.msk [vmem:[#allocation5] sm:$0xf] %vm255_vm1, %v253_v7 }
 0x129   :  { %317 = shalt.err (!%p314_p12)
}
 0x12a   :  { %s318_s24 = scalar_lea.hbm %s374_s1, 64 }
 0x12b   :  { %p319_p13 = scmp.ne.s32.totalorder %s374_s1, %s318_s24  ;;  %p322_p0 = scmp.lt.u32.totalorder %s318_s24, %s374_s1 }
 0x12d   :  { %p324_p1 = pnand %p322_p0, %p319_p13 }
 0x12f   :  { %327 = shalt.err (!%p324_p1)
}
 0x130   :  { %266 = dma.vmem_to_hbm [thread:$0]  %s264_s20, 64, %s374_s1, [#allocation4]  }
 0x131   :  { %330 = dma.done.wait [#allocation4], 64  }
 0x132   :  { %331 = vsyncadd [#allocation4], 4294967232 }
 0x133   :  { %270 = vsyncpa [#allocation3], 1 }
 0x134   :  { %271 = vsyncpa [#allocation4], 1 }

// kernel: tpu_custom_call.1
= control target key start
LH: loop header
LB: loop body
LE: loop exit
PB: predicated region body
PF: predicated region fallthrough
CT: control target
= control target key end

     0   :  { %s3456_s0 = inlined_call_operand.hbm [shape: f32[2,8,32], index: 0, kind: input, shape index: {}]   ;;  %s3457_s1 = inlined_call_operand.vmem [shape: f32[2,1,8], index: 1, kind: input, shape index: {}]   ;;  %s3458_s2 = inlined_call_operand.hbm [shape: f32[1,32], index: 2, kind: input, shape index: {}]   ;;  %s3459_s3 = inlined_call_operand.hbm [shape: f32[1,32], index: 3, kind: input, shape index: {}]   ;;  %s3460_s4 = inlined_call_operand.vmem [shape: bf16[2,32,32], index: 4, kind: input, shape index: {}]   ;;  %s3461_s5 = inlined_call_operand.vmem [shape: f32[2,1,32], index: 5, kind: input, shape index: {}]   ;;  %s3462_s6 = inlined_call_operand.vmem [shape: bf16[2,32,32], index: 6, kind: input, shape index: {}]   ;;  %s3463_s7 = inlined_call_operand.vmem [shape: f32[2,1,32], index: 7, kind: input, shape index: {}]   ;;  %s3464_s8 = inlined_call_operand.vmem [shape: bf16[2,32,32], index: 8, kind: input, shape index: {}]   ;;  %s3465_s9 = inlined_call_operand.vmem [shape: f32[2,1,32], index: 9, kind: input, shape index: {}]   ;;  %s3466_s10 = inlined_call_operand.hbm [shape: bf16[2,32,32], index: 10, kind: input, shape index: {}]   ;;  %s3467_s11 = inlined_call_operand.vmem [shape: f32[2,1,32], index: 11, kind: input, shape index: {}]   ;;  %s3468_s12 = inlined_call_operand.vmem [shape: f32[2,1,32], index: 12, kind: input, shape index: {}]   ;;  %s3469_s13 = inlined_call_operand.vmem [shape: f32[2,1,32], index: 13, kind: input, shape index: {}]   ;;  %s3470_s14 = inlined_call_operand.hbm [shape: bf16[2,32,64], index: 14, kind: input, shape index: {}]   ;;  %s3471_s15 = inlined_call_operand.vmem [shape: f32[2,1,64], index: 15, kind: input, shape index: {}]   ;;  %s3472_s16 = inlined_call_operand.vmem [shape: bf16[2,64,32], index: 16, kind: input, shape index: {}]   ;;  %s3473_s17 = inlined_call_operand.vmem [shape: f32[2,1,32], index: 17, kind: input, shape index: {}]   ;;  %s3474_s18 = inlined_call_operand.vmem [shape: f32[2,1,32], index: 18, kind: input, shape index: {}]   ;;  %s3475_s19 = inlined_call_operand.vmem [shape: f32[2,1,32], index: 19, kind: input, shape index: {}]   ;;  %s3476_s20 = inlined_call_operand.hbm [shape: f32[2,8,32], index: 20, kind: output, shape index: {}]  }
   0x1   :  { %3519 = sst [smem:[#allocation35_spill]] %s3456_s0 }
   0x2   :  { %3520 = sst [smem:[#allocation36_spill]] %s3457_s1 }
   0x3   :  { %3521 = sst [smem:[#allocation37_spill]] %s3458_s2 }
   0x4   :  { %3522 = sst [smem:[#allocation38_spill]] %s3459_s3 }
   0x5   :  { %3523 = sst [smem:[#allocation39_spill]] %s3460_s4 }
   0x6   :  { %3524 = sst [smem:[#allocation40_spill]] %s3461_s5 }
   0x7   :  { %3525 = sst [smem:[#allocation41_spill]] %s3462_s6 }
   0x8   :  { %3526 = sst [smem:[#allocation42_spill]] %s3463_s7 }
   0x9   :  { %3527 = sst [smem:[#allocation43_spill]] %s3464_s8 }
   0xa   :  { %3528 = sst [smem:[#allocation44_spill]] %s3465_s9 }
   0xb   :  { %3529 = sst [smem:[#allocation45_spill]] %s3466_s10 }
   0xc   :  { %3530 = sst [smem:[#allocation46_spill]] %s3467_s11 }
   0xd   :  { %3531 = sst [smem:[#allocation47_spill]] %s3468_s12 }
   0xe   :  { %3532 = sst [smem:[#allocation48_spill]] %s3469_s13 }
   0xf   :  { %3533 = sst [smem:[#allocation49_spill]] %s3470_s14 }
  0x10   :  { %3534 = sst [smem:[#allocation50_spill]] %s3471_s15 }
  0x11   :  { %3535 = sst [smem:[#allocation51_spill]] %s3472_s16 }
  0x12   :  { %3536 = sst [smem:[#allocation52_spill]] %s3473_s17 }
  0x13   :  { %3537 = sst [smem:[#allocation53_spill]] %s3474_s18 }
  0x14   :  { %3538 = sst [smem:[#allocation54_spill]] %s3475_s19 }
  0x15   :  { %3539 = sst [smem:[#allocation55_spill]] %s3476_s20 }
  0x16   :  { %25 = vsyncpa [#allocation3], 0 }
  0x17   :  { %27 = vsyncpa [#allocation3 + $0x1], 0 }
  0x18   :  { %28 = vsyncpa [#allocation6], 0 }
  0x19   :  { %29 = vsyncpa [#allocation9], 0 }
  0x1a   :  { %31 = vsyncpa [#allocation9 + $0x1], 0 }
  0x1b   :  { %32 = vsyncpa [#allocation4], 0 }
  0x1c   :  { %34 = vsyncpa [#allocation4 + $0x1], 0  ;;  %s2816_s1 = smov 0   ;;  %s2818_s22 = smov 0  }
  0x1d   :  { %s2820_s23 = smov 0   ;;  %s2822_s24 = smov 0  }
  0x1e   :  { %s2824_s2 = smov 0   ;;  %s2826_s25 = smov 0  }
  0x1f   :  { %s2828_s3 = smov 0   ;;  %s2830_s26 = smov 0  }
  0x20   :  { %s2832_s27 = smov 0   ;;  %s2834_s28 = smov 0  }
  0x21   :  { %s2836_s4 = smov 0  }
  0x22 LB: > { %3540 = sst [smem:[#allocation16_spill]] %s2661_s22  ;;  %s2870_s29 = sadd.s32 4294967295, %s2697_s4   ;;  %s2697_s4 = sphi %s2836_s4, %s40_s4   ;;  %s2693_s28 = sphi %s2834_s28, %s3650_s28   ;;  %s2689_s27 = sphi %s2832_s27, %s3649_s27   ;;  %s2685_s26 = sphi %s2830_s26, %s3648_s26   ;;  %s2681_s3 = sphi %s2828_s3, %s3647_s3   ;;  %s2677_s25 = sphi %s2826_s25, %s3646_s25   ;;  %s2673_s2 = sphi %s2824_s2, %s3645_s2   ;;  %s2669_s24 = sphi %s2822_s24, %s3644_s24   ;;  %s2665_s23 = sphi %s2820_s23, %s3643_s23   ;;  %s2661_s22 = sphi %s2818_s22, %s3642_s22   ;;  %s2657_s1 = sphi %s2816_s1, %s3641_s1  }
  0x23   : > { %3541 = sst [smem:[#allocation17_spill]] %s2665_s23  ;;  %p322_p0 = scmp.ne.s32.totalorder %s2661_s22, %s2657_s1 }
  0x24   : > { %3542 = sst [smem:[#allocation18_spill]] %s2669_s24  ;;  %p3481_p1 = scmp.eq.s32.totalorder %s2870_s29, 0 }
  0x25   : > { %3543 = sst [smem:[#allocation19_spill]] %s2673_s2  ;;  %p2069_p2 = scmp.ge.s32.totalorder %s2697_s4, 1 }
  0x26   : > { %3544 = sst [smem:[#allocation20_spill]] %s2677_s25  ;;  %p593_p3 = scmp.lt.s32.totalorder %s2697_s4, 5 }
  0x27   : > { %3545 = sst [smem:[#allocation21_spill]] %s2681_s3  ;;  %p2878_p4 = por %p322_p0, %p3481_p1 }
  0x28   : > { %3546 = sst [smem:[#allocation22_spill]] %s2685_s26  ;;  %p2882_p5 = pnand %p2069_p2, %p593_p3 }
  0x29   : > { %3547 = sst [smem:[#allocation23_spill]] %s2689_s27  ;;  %s2699_s21 = smov [#allocation5]  }
  0x2a   : > { %3548 = sst [smem:[#allocation24_spill]] %s2693_s28  ;;  %s606_s20 = sshll.u32 %s2699_s21, 4  ;;  %s607_s20 = int_to_ptr.vmem [resolvable:$true] %s606_s20 }
  0x2b   : > { %3549 = sst [smem:[#allocation25_spill]] %s2697_s4  ;;  %p2264_p6 = pneg %p2882_p5 }
  0x2c   : > { %s3550_s30 = scalar_select %p2878_p4, 1, 0 }
  0x2d   : > { %s3552_s0 = scalar_select %p2882_p5, 1, 0 }
  0x2e   : > { %3551 = sst [smem:[#allocation26_spill]] %s3550_s30  ;;  %p2890_p7 = pnand %p2264_p6, %p3481_p1 }
  0x2f   : > { %3553 = sst [smem:[#allocation27_spill]] %s3552_s0  ;;  %s49_s19 = sadd.s32 1, %s2689_s27 }
  0x30   : > { %p2895_p8 = scmp.ge.s32.totalorder %s49_s19, 2  ;;  %s3556_s15 = sld [smem:[#allocation37_spill]] }
  0x31   : > { %p3491_p10 = pneg %p2890_p7 }
  0x32   : > { %s3555_s18 = scalar_select %p2895_p8, 1, 0 }
  0x36   : > { %s2421_s13 = scalar_lea.hbm %s3556_s15, 16 }
  0x37   : > { %p2422_p9 = scmp.ne.s32.totalorder %s3556_s15, %s2421_s13  ;;  %p2428_p13 = scmp.lt.u32.totalorder %s2421_s13, %s3556_s15 }
  0x39   : > { %p2424_p11 = pnand %p3491_p10, %p2422_p9 }
  0x3b   : > { %p2425_p12 = pneg %p2424_p11 }
  0x3d   : > { %p2430_p0 = pnand %p2428_p13, %p2425_p12 }
  0x3f   : > { %2433 = shalt.err (!%p2430_p0)
}
  0x40   : > { %s2434_s8 = scalar_lea.vmem %s607_s20, 16  ;;  %s2441_s12 = scalar_lea.vmem %s607_s20, 32 }
  0x41   : > { %p2435_p2 = scmp.ne.s32.totalorder %s607_s20, %s2434_s8  ;;  %p2442_p1 = scmp.lt.s32.totalorder %s607_s20, %s607_s20 }
  0x42   : > { %p2443_p4 = scmp.lt.s32.totalorder %s2441_s12, %s2434_s8 }
  0x43   : > { %p2437_p3 = pnand %p2435_p2, %p3491_p10 }
  0x44   : > { %p2444_p5 = por %p2443_p4, %p2442_p1 }
  0x45   : > { %p2438_p6 = pneg %p2437_p3 }
  0x47   : > { %p2445_p8 = pnand %p2444_p5, %p2438_p6 }
  0x49   : > { %2448 = shalt.err (!%p2445_p8)
}
  0x4a   : > { %2267 = dma.hbm_to_vmem [thread:$0]  (!%p2890_p7), %s3556_s15, 16, %s607_s20, [#allocation6]  }
  0x4b   : > { %p3557_p1 = scmp.ne.s32.totalorder %s3555_s18, 0  ;;  %p3490_p4 = scmp.eq.s32.totalorder %s2697_s4, 0 }
  0x4c   : > { %s309_s8 = sadd.s32 1, %s2665_s23  ;;  %p316_p5 = scmp.ne.s32.totalorder %s2665_s23, %s2661_s22 }
  0x4d   : > { %s3652_s19 = smov (%p3557_p1, %s49_s19), 0  ;;  %p3489_p9 = scmp.lt.s32.totalorder %s2697_s4, 4 }
  0x4e   : > { %3558 = sst [smem:[#allocation28_spill]] %s3652_s19  ;;  %s306_s11 = ssub.s32 %s2689_s27, %s3652_s19 }
  0x4f   : > { %p307_p8 = scmp.eq.s32.totalorder %s306_s11, 0  ;;  %p318_p11 = por %p316_p5, %p3490_p4 }
  0x50   : > { %s694_s13 = sand.u32 1, %s2697_s4   ;;  %s696_s21 = sand.u32 1, %s2665_s23  }
  0x51   : > { %s2936_s17 = scalar_select %p307_p8, %s2665_s23, %s309_s8  }
  0x52   : > { %s2939_s12 = sshll.u32 %s696_s21, 4  ;;  %s3487_s20 = sshll.u32 %s2689_s27, 8 }
  0x53   : > { %3559 = sst [smem:[#allocation29_spill]] %s2936_s17  ;;  %s3560_s10 = sld [smem:[#allocation45_spill]] }
  0x54   : > { %s698_s11 = scalar_lea.vmem [#allocation8], %s2939_s12  ;;  %p2952_p12 = pnand %p3489_p9, %p318_p11 }
  0x55   : > { %s705_s19 = sshll.u32 %s698_s11, 4  ;;  %s2958_s21 = scalar_lea.sflag [#allocation9], %s694_s13  ;;  %s2956_s19 = int_to_ptr.vmem [resolvable:$true] %s705_s19 }
  0x56   : > { %s3561_s8 = scalar_select %p2952_p12, 1, 0 }
  0x57   : > { %p3500_p0 = pneg %p2952_p12 }
  0x58   : > { %3562 = sst [smem:[#allocation30_spill]] %s3561_s8 }
  0x59   : > { %s2947_s15 = scalar_lea.hbm %s3560_s10, %s3487_s20  ;;  %s2454_s20 = scalar_lea.hbm %s3560_s10, 512 }
  0x5a   : > { %s2449_s16 = scalar_lea.hbm %s2947_s15, 256  ;;  %p2455_p6 = scmp.lt.u32.totalorder %s2947_s15, %s3560_s10 }
  0x5b   : > { %p2450_p13 = scmp.ne.s32.totalorder %s2947_s15, %s2449_s16  ;;  %p2456_p5 = scmp.lt.u32.totalorder %s2454_s20, %s2449_s16 }
  0x5c   : > { %p2458_p11 = scmp.lt.u32.totalorder %s2449_s16, %s2947_s15 }
  0x5d   : > { %p2452_p2 = pnand %p3500_p0, %p2450_p13  ;;  %p2457_p8 = por %p2456_p5, %p2455_p6 }
  0x5f   : > { %p2453_p3 = pneg %p2452_p2  ;;  %p2459_p9 = por %p2458_p11, %p2457_p8 }
  0x61   : > { %p2460_p4 = pnand %p2459_p9, %p2453_p3 }
  0x63   : > { %2463 = shalt.err (!%p2460_p4)
}
  0x64   : > { %s2464_s13 = scalar_lea.vmem %s2956_s19, 256  ;;  %s2700_s9 = smov [#allocation8]  }
  0x65   : > { %p2465_p13 = scmp.ne.s32.totalorder %s2956_s19, %s2464_s13  ;;  %s2469_s11 = sshll.u32 %s2700_s9, 4  ;;  %s2470_s11 = int_to_ptr.vmem [resolvable:$false] %s2469_s11 }
  0x66   : > { %s2471_s23 = scalar_lea.vmem %s2470_s11, 512  ;;  %p2472_p1 = scmp.lt.s32.totalorder %s2956_s19, %s2470_s11 }
  0x67   : > { %p2467_p2 = pnand %p2465_p13, %p3500_p0  ;;  %p2473_p6 = scmp.lt.s32.totalorder %s2471_s23, %s2464_s13 }
  0x69   : > { %p2468_p10 = pneg %p2467_p2  ;;  %p2474_p5 = por %p2473_p6, %p2472_p1 }
  0x6b   : > { %p2475_p8 = pnand %p2474_p5, %p2468_p10 }
  0x6d   : > { %2478 = shalt.err (!%p2475_p8)
}
  0x6e   : > { %s3503_s17 = smov 64   ;;  %s2702_s20 = smov 4  }
  0x6f   : > { %2277 = dma.hbm_to_vmem [thread:$0]  (!%p2952_p12), %s2947_s15, 256, %s2956_s19, %s2958_s21, %s3503_s17, %s3503_s17, %s2702_s20  }
  0x70   : > { %s3563_s16 = sshll.u32 %s2689_s27, 8  ;;  %s3564_s14 = sld [smem:[#allocation49_spill]] }
  0x71   : > { %s737_s23 = scalar_lea.vmem [#allocation10], %s2939_s12  ;;  %s2703_s7 = smov [#allocation7]  }
  0x72   : > { %s2998_s10 = sshll.u32 %s737_s23, 4  ;;  %s617_s6 = sshll.u32 %s2703_s7, 4  ;;  %s618_s6 = int_to_ptr.vmem [resolvable:$true] %s617_s6  ;;  %s3075_s10 = int_to_ptr.vmem [resolvable:$true] %s2998_s10 }
  0x73   : > { %s3565_s26 = sld [smem:[#allocation38_spill]]  ;;  %p3567_p1 = pneg %p2890_p7 }
  0x76   : > { %s2995_s11 = scalar_lea.hbm %s3564_s14, %s3563_s16 }
  0x79   : > { %s3566_s30 = smov %s3565_s26  ;;  %s2479_s22 = scalar_lea.hbm %s3565_s26, 16 }
  0x7a   : > { %p2480_p10 = scmp.ne.s32.totalorder %s3566_s30, %s2479_s22  ;;  %p2486_p11 = scmp.lt.u32.totalorder %s2479_s22, %s3566_s30 }
  0x7c   : > { %p2482_p9 = pnand %p2480_p10, %p3567_p1 }
  0x7e   : > { %p2483_p3 = pneg %p2482_p9 }
  0x80   : > { %p2488_p13 = pnand %p2486_p11, %p2483_p3 }
  0x82   : > { %2491 = shalt.err (!%p2488_p13)
}
  0x83   : > { %s2492_s7 = scalar_lea.vmem %s618_s6, 16  ;;  %p3568_p6 = pmov %p3567_p1 }
  0x84   : > { %p2493_p2 = scmp.ne.s32.totalorder %s618_s6, %s2492_s7  ;;  %s2499_s5 = scalar_lea.vmem %s618_s6, 32 }
  0x85   : > { %p2500_p0 = scmp.lt.s32.totalorder %s618_s6, %s618_s6  ;;  %p2501_p4 = scmp.lt.s32.totalorder %s2499_s5, %s2492_s7 }
  0x86   : > { %p2495_p5 = pnand %p2493_p2, %p3568_p6 }
  0x87   : > { %p2502_p12 = por %p2501_p4, %p2500_p0 }
  0x88   : > { %p2496_p8 = pneg %p2495_p5 }
  0x8a   : > { %p2503_p1 = pnand %p2502_p12, %p2496_p8 }
  0x8c   : > { %2506 = shalt.err (!%p2503_p1)
}
  0x8d   : > { %2270 = dma.hbm_to_vmem [thread:$0]  (!%p2890_p7), %s3566_s30, 16, %s618_s6, [#allocation6]  }
  0x8e   : > { %s2068_s22 = sadd.s32 4294967294, %s2697_s4   ;;  %s52_s0 = sadd.s32 1, %s2693_s28 }
  0x8f   : > { %s59_s1 = sadd.s32 1, %s2677_s25  ;;  %p3569_p12 = scmp.ne.s32.totalorder %s3555_s18, 0 }
  0x90   : > { %p66_p0 = scmp.ne.s32.totalorder %s2677_s25, %s2673_s2  ;;  %p72_p4 = scmp.ne.s32.totalorder %s2673_s2, %s2669_s24 }
  0x91   : > { %s3654_s0 = smov (!%p3569_p12, %s52_s0), %s2693_s28  ;;  %p586_p9 = scmp.eq.s32.totalorder %s2068_s22, 3 }
  0x92   : > { %p54_p10 = scmp.ge.s32.totalorder %s3654_s0, 2  ;;  %p3570_p3 = scmp.eq.s32.totalorder %s2697_s4, 0 }
  0x93   : > { %p3572_p13 = scmp.eq.s32.totalorder %s2870_s29, 0  ;;  %p3575_p2 = scmp.eq.s32.totalorder %s2870_s29, 3 }
  0x94   : > { %p3032_p11 = por %p3570_p3, %p66_p0  ;;  %s3656_s0 = smov (%p54_p10, %s3654_s0), 0 }
  0x95   : > { %p3038_p7 = por %p3572_p13, %p72_p4  ;;  %3574 = sst [smem:[#allocation31_spill]] %s3656_s0 }
  0x96   : > { %p3046_p6 = por %p3575_p2, %p66_p0  ;;  %p3050_p5 = por %p586_p9, %p72_p4 }
  0x97   : > { %s56_s16 = ssub.s32 %s2693_s28, %s3656_s0  ;;  %s628_s13 = sand.u32 1, %s2677_s25  }
  0x98   : > { %s3576_s18 = scalar_select %p3046_p6, 1, 0 }
  0x99   : > { %s3578_s8 = scalar_select %p3050_p5, 1, 0 }
  0x9a   : > { %3577 = sst [smem:[#allocation32_spill]] %s3576_s18  ;;  %p57_p8 = scmp.eq.s32.totalorder %s56_s16, 0 }
  0x9b   : > { %3579 = sst [smem:[#allocation33_spill]] %s3578_s8  ;;  %s2073_s9 = sshll.u32 %s628_s13, 3 }
  0x9c   : > { %s2074_s23 = sshll.u32 %s2693_s28, 7  ;;  %s3581_s5 = sld [smem:[#allocation35_spill]] }
  0x9d   : > { %s3059_s15 = scalar_select %p57_p8, %s2677_s25, %s59_s1  }
  0x9e   : > { %s632_s26 = scalar_lea.vmem [#allocation2], %s2073_s9  ;;  %p3582_p1 = scmp.lt.s32.totalorder %s2697_s4, 4 }
  0x9f   : > { %3580 = sst [smem:[#allocation34_spill]] %s3059_s15  ;;  %s639_s22 = sshll.u32 %s632_s26, 4  ;;  %s3077_s22 = int_to_ptr.vmem [resolvable:$true] %s639_s22 }
  0xa0   : > { %p3070_p12 = pnand %p3582_p1, %p3032_p11  ;;  %s629_s1 = scalar_lea.sflag [#allocation3], %s628_s13 }
  0xa2   : > { %s3064_s3 = scalar_lea.hbm %s3581_s5, %s2074_s23  ;;  %p2509_p4 = pneg %p3070_p12 }
  0xa3   : > { %s2507_s16 = scalar_lea.hbm %s3064_s3, 128  ;;  %s2512_s23 = scalar_lea.hbm %s3581_s5, 256 }
  0xa4   : > { %p2508_p0 = scmp.ne.s32.totalorder %s3064_s3, %s2507_s16  ;;  %p2513_p3 = scmp.lt.u32.totalorder %s3064_s3, %s3581_s5 }
  0xa5   : > { %p2514_p11 = scmp.lt.u32.totalorder %s2512_s23, %s2507_s16  ;;  %p2516_p2 = scmp.lt.u32.totalorder %s2507_s16, %s3064_s3 }
  0xa6   : > { %p2510_p10 = pnand %p2509_p4, %p2508_p0 }
  0xa7   : > { %p2515_p13 = por %p2514_p11, %p2513_p3 }
  0xa8   : > { %p2511_p9 = pneg %p2510_p10 }
  0xa9   : > { %p2517_p8 = por %p2516_p2, %p2515_p13 }
  0xab   : > { %p2518_p1 = pnand %p2517_p8, %p2511_p9 }
  0xad   : > { %2521 = shalt.err (!%p2518_p1)
}
  0xae   : > { %s2522_s13 = scalar_lea.vmem %s3077_s22, 128  ;;  %s2704_s26 = smov [#allocation2]  }
  0xaf   : > { %p2523_p0 = scmp.ne.s32.totalorder %s3077_s22, %s2522_s13  ;;  %s2527_s12 = sshll.u32 %s2704_s26, 4  ;;  %s2528_s12 = int_to_ptr.vmem [resolvable:$false] %s2527_s12 }
  0xb0   : > { %s2529_s9 = scalar_lea.vmem %s2528_s12, 256  ;;  %p2530_p6 = scmp.lt.s32.totalorder %s3077_s22, %s2528_s12 }
  0xb1   : > { %p2525_p10 = pnand %p2523_p0, %p2509_p4  ;;  %p2531_p3 = scmp.lt.s32.totalorder %s2529_s9, %s2522_s13 }
  0xb3   : > { %p2526_p5 = pneg %p2525_p10  ;;  %p2532_p11 = por %p2531_p3, %p2530_p6 }
  0xb5   : > { %p2533_p13 = pnand %p2532_p11, %p2526_p5 }
  0xb7   : > { %2536 = shalt.err (!%p2533_p13)
}
  0xb8   : > { %s3584_s16 = sld [smem:[#allocation30_spill]]  ;;  %s2537_s23 = scalar_lea.hbm %s2995_s11, 256 }
  0xb9   : > { %2274 = dma.hbm_to_vmem [thread:$0]  (!%p3070_p12), %s3064_s3, 128, %s3077_s22, %s629_s1  }
  0xba   : > { %p2538_p4 = scmp.ne.s32.totalorder %s2995_s11, %s2537_s23  ;;  %s2542_s13 = scalar_lea.hbm %s3564_s14, 512 }
  0xbb   : > { %p2543_p6 = scmp.lt.u32.totalorder %s2995_s11, %s3564_s14  ;;  %p2544_p5 = scmp.lt.u32.totalorder %s2542_s13, %s2537_s23 }
  0xbc   : > { %p2546_p10 = scmp.lt.u32.totalorder %s2537_s23, %s2995_s11 }
  0xbd   : > { %p2545_p0 = por %p2544_p5, %p2543_p6 }
  0xbe   : > { %p3585_p9 = scmp.ne.s32.totalorder %s3584_s16, 0 }
  0xbf   : > { %p2547_p3 = por %p2546_p10, %p2545_p0 }
  0xc0   : > { %p3586_p2 = pneg %p3585_p9 }
  0xc2   : > { %p2540_p8 = pnand %p2538_p4, %p3586_p2 }
  0xc4   : > { %p2541_p1 = pneg %p2540_p8 }
  0xc6   : > { %p2548_p11 = pnand %p2547_p3, %p2541_p1 }
  0xc8   : > { %2551 = shalt.err (!%p2548_p11)
}
  0xc9   : > { %s2552_s3 = scalar_lea.vmem %s3075_s10, 256  ;;  %p3587_p13 = pmov %p3586_p2 }
  0xca   : > { %p2553_p12 = scmp.ne.s32.totalorder %s3075_s10, %s2552_s3  ;;  %s2705_s22 = smov [#allocation10]  }
  0xcb   : > { %s2557_s1 = sshll.u32 %s2705_s22, 4  ;;  %s2558_s1 = int_to_ptr.vmem [resolvable:$false] %s2557_s1 }
  0xcc   : > { %p2555_p4 = pnand %p2553_p12, %p3587_p13  ;;  %s2559_s12 = scalar_lea.vmem %s2558_s1, 512 }
  0xcd   : > { %p2560_p8 = scmp.lt.s32.totalorder %s3075_s10, %s2558_s1  ;;  %p2561_p6 = scmp.lt.s32.totalorder %s2559_s12, %s2552_s3 }
  0xce   : > { %p2556_p2 = pneg %p2555_p4 }
  0xcf   : > { %p2562_p5 = por %p2561_p6, %p2560_p8 }
  0xd1   : > { %p2563_p0 = pnand %p2562_p5, %p2556_p2 }
  0xd3   : > { %2566 = shalt.err (!%p2563_p0)
}
  0xd4   : > { %s3588_s9 = smov 64   ;;  %s3589_s23 = sld [smem:[#allocation27_spill]] }
  0xd5   : > { %2280 = dma.hbm_to_vmem [thread:$0]  (!%p3585_p9), %s2995_s11, 256, %s3075_s10, %s2958_s21, %s3588_s9, %s3588_s9, %s2702_s20  }
  0xda   : > { %p3590_p1 = scmp.ne.s32.totalorder %s3589_s23, 0 }
  0xdb   : > { %s3134_s19 = sand.u32 (!%p3590_p1), 1, %s2673_s2  }
  0xdc   : > { %788 = sbr.rel (%p3590_p1) target bundleno = 2935 (0xb77), region = 100  ;;  %s3505_s7 = sshll.u32 (!%p3590_p1), %s3134_s19, 3 }
  0xdd   : > { %s791_s13 = scalar_lea.sflag (!%p3590_p1), [#allocation3], %s3134_s19  ;;  %s3140_s16 = scalar_lea.vmem (!%p3590_p1), [#allocation2], %s3505_s7 }
  0xe3   : > { %2640 = dma.done.wait (%p3038_p7), %s791_s13, 128  }
  0xe4   : > { %2642 = vsyncadd (%p3038_p7), %s791_s13, 4294967168  ;;  %p3591_p9 = scmp.eq.s32.totalorder %s2870_s29, 0 }
  0xe6   : > { %2644 = dma.done.wait (%p3591_p9), [#allocation6], 32   ;;  %p3592_p10 = pmov %p3591_p9 }
  0xe7   : > { %s3593_s10 = sld [smem:[#allocation16_spill]]  ;;  %s3594_s21 = sld [smem:[#allocation26_spill]] }
  0xe8   : > { %2646 = vsyncadd (%p3592_p10), [#allocation6], 4294967264  ;;  %s807_s20 = sand.u32 1, %s2870_s29  }
  0xe9   : > { %s808_s17 = scalar_lea.sflag [#allocation9], %s807_s20 }
  0xed   : > { %s809_s11 = sand.u32 1, %s3593_s10   ;;  %p3595_p3 = scmp.ne.s32.totalorder %s3594_s21, 0 }
  0xee   : > { %s3152_s26 = sshll.u32 %s809_s11, 4 }
  0xef   : > { %2648 = dma.done.wait (%p3595_p3), %s808_s17, 512  }
  0xf0   : > { %2650 = vsyncadd (%p3595_p3), %s808_s17, 4294966784  ;;  %s3596_s6 = sld [smem:[#allocation22_spill]]  ;;  %s3597_s22 = sld [smem:[#allocation21_spill]] }
  0xf1   : > { %s3600_s12 = sld [smem:[#allocation39_spill]]  ;;  %s3601_s14 = sld [smem:[#allocation41_spill]] }
  0xf2   : > { %s3603_s10 = sld [smem:[#allocation43_spill]]  ;;  %s3604_s17 = sld [smem:[#allocation44_spill]] }
  0xf3   : > { %s3608_s15 = sld [smem:[#allocation50_spill]]  ;;  %s3609_s20 = sld [smem:[#allocation51_spill]] }
  0xf4   : > { %s3611_s7 = sld [smem:[#allocation53_spill]]  ;;  %s3612_s23 = sld [smem:[#allocation54_spill]] }
  0xf5   : > { %s820_s28 = scalar_lea.vmem [#allocation10], %s3152_s26  ;;  %s3613_s27 = sshll.u32 %s3134_s19, 3 }
  0xf6   : > { %p940_p7 = scmp.lt.s32.totalorder %s3596_s6, 1  ;;  %p943_p11 = scmp.lt.s32.totalorder %s3597_s22, 1 }
  0xf7   : > { %p2096_p12 = scmp.ne.s32.totalorder %s3597_s22, 0 }
  0xf8   : > { %s3658_s6 = smov (!%p940_p7, %s3596_s6), 1  ;;  %v998_v0 = vld [vmem:[%s3140_s16] sm:$0xff] (!%p2096_p12)  ;;  %vm1001_vm0 = vcmask (!%p2096_p12), 261120   ;;  %v2097_v11 = vld [vmem:[#allocation5] ss:$0 sm:$0xff] (!%p2096_p12) }
  0xf9   : > { %s3165_s29 = scalar_select %p943_p11, %s3597_s22, 1 }
  0xfa   : > { %v1002_v1 = vsel (!%p2096_p12), %vm1001_vm0, %v998_v0, 0.0  ;;  %v2098_v13 = vld [vmem:[#allocation7] ss:$0 sm:$0xff] (!%p2096_p12) }
  0xfb   : > { %s2140_s13 = sshll.u32 %s3165_s29, 4  ;;  %s966_s1 = scalar_lea.vmem %s3604_s17, %s3165_s29  ;;  %1003 = vadd.xlane.f32.xlu0 (!%p2096_p12), %v1002_v1 }
  0xfc   : > { %s3179_s3 = scalar_lea.vmem %s3600_s12, %s2140_s13  ;;  %s3184_s30 = scalar_lea.vmem %s3601_s14, %s2140_s13 }
  0xfd   : > { %s3193_s21 = scalar_lea.vmem %s3603_s10, %s2140_s13  ;;  %s978_s13 = scalar_lea.vmem %s3608_s15, %s3165_s29 }
  0xfe   : > { %s2143_s10 = sshll.u32 %s3165_s29, 5  ;;  %s3610_s12 = sld [smem:[#allocation52_spill]] }
  0xff   : > { %s3219_s17 = scalar_lea.vmem %s3609_s20, %s2143_s10  ;;  %s989_s24 = scalar_lea.vmem %s3611_s7, %s3165_s29 }
 0x100   : > { %s992_s9 = scalar_lea.vmem %s3612_s23, %s3165_s29  ;;  %s3236_s15 = scalar_lea.vmem [#allocation11], %s3613_s27 }
 0x101   : > { %997 = sbr.rel (%p2096_p12) target bundleno = 564 (0x234), region = 124 }
 0x104   : > { %s986_s8 = scalar_lea.vmem %s3610_s12, %s3165_s29 }
 0x188   : > { %v1004_v2 = vpop.xlane.xlu0 %1003 }
 0x189   : > { %v1006_v3 = vmul.f32 0.03125, %v1004_v2 }
 0x18b   : > { %v1007_v4 = vsub.f32 %v998_v0, %v1006_v3 }
 0x18d   : > { %v1008_v5 = vmul.f32 %v1007_v4, %v1007_v4 }
 0x18f   : > { %v1009_v6 = vsel %vm1001_vm0, %v1008_v5, 0.0 }
 0x190   : > { %1010 = vadd.xlane.f32.xlu0 %v1009_v6 }
 0x21d   : > { %v1011_v7 = vpop.xlane.xlu0 %1010 }
 0x21e   : > { %v1012_v8 = vmul.f32 0.03125, %v1011_v7 }
 0x220   : > { %v1013_v9 = vadd.f32 1e-12, %v1012_v8 }
 0x222   : > { %2387 = vrsqrt.f32 %v1013_v9 }
 0x22c   : > { %v2388_v10 = vpop.eup %2387 }
 0x22d   : > { %v1015_v12 = vmul.f32 %v2388_v10, %v1007_v4 }
 0x22f   : > { %v1022_v14 = vmul.f32 %v2097_v11, %v1015_v12 }
 0x231   : > { %v1029_v15 = vadd.f32 %v2098_v13, %v1022_v14 }
 0x233   : > { %1030 = vst.msk [vmem:[%s3236_s15] sm:$0xff] %vm1001_vm0, %v1029_v15 }
 0x234 PF: > { %v2389_v16 = vld [vmem:[%s3184_s30] sm:$0xff]   ;;  %v2706_v17 = vmov 0.0   ;;  %v2390_v18 = vld [vmem:[%s3184_s30 + $0x8] sm:$0xff]   ;;  %vm2707_vm1 = vmmov 0   ;;  %vm1057_vm2 = vcmask 261120   ;;  %s3614_s16 = sld [smem:[#allocation42_spill]] }
 0x235   : > { %2180 = vmatprep.subr.bf16.mxu1 %v2706_v17  ;;  %2172 = vmatprep.subr.bf16.mxu0 %v2706_v17  ;;  %v2391_v19 = vld [vmem:[%s3179_s3] sm:$0xff]   ;;  %v2392_v21 = vld [vmem:[%s3179_s3 + $0x8] sm:$0xff]   ;;  %s3616_s11 = sld [smem:[#allocation40_spill]]  ;;  %vm1245_vm3 = vcmask 130048   ;;  %s2708_s20 = smov 112   ;;  %vm1372_vm4 = vcmask 1043456  }
 0x236   : > { %2181 = vmatpush3.bf16.msra.mxu1 %v2389_v16  ;;  %2184 = vmatprep.mubr.msk.bf16.mxu1 %vm2707_vm1, %v2706_v17  ;;  %v2393_v23 = vld [vmem:[%s3193_s21] sm:$0xff]   ;;  %v2394_v24 = vld [vmem:[%s3193_s21 + $0x8] sm:$0xff]   ;;  %s3619_s14 = sld [smem:[#allocation36_spill]]  ;;  %vm1338_vm5 = vcmask 64512   ;;  %s2709_s0 = smov 16   ;;  %vm1688_vm6 = vcmask 523264  }
 0x237   : > { %2182 = vmatprep.subr.bf16.mxu1 %v2706_v17  ;;  %2176 = vmatprep.mubr.msk.bf16.mxu0 %vm2707_vm1, %v2706_v17  ;;  %v2107_v40 = vld [vmem:[%s966_s1] ss:$0 sm:$0xff]  ;;  %s3623_s30 = sld [smem:[#allocation46_spill]]  ;;  %s3625_s22 = sld [smem:[#allocation47_spill]] }
 0x238   : > { %2173 = vmatpush3.bf16.msra.mxu0 %v2391_v19  ;;  %s3631_s1 = sld [smem:[#allocation22_spill]]  ;;  %s1777_s27 = sshll.u32 %s3236_s15, 4  ;;  %s3393_s27 = int_to_ptr.vmem [resolvable:$true] %s1777_s27 }
 0x239   : > { %2174 = vmatprep.subr.bf16.mxu0 %v2706_v17 }
 0x23a   : > { %v3253_v20 = vld [vmem:[%s3236_s15] sm:$0xff]  ;;  %2183 = vmatpush3.bf16.msra.mxu1 %v2390_v18  ;;  %s3615_s3 = scalar_lea.vmem %s3614_s16, %s3165_s29  ;;  %s3635_s16 = sld [smem:[#allocation55_spill]] }
 0x23b   : > { %v1033_v22 = vpack.c.bf16 %v3253_v20, %v3253_v20  ;;  %2196 = vmatprep.subr.bf16.mxu1 %v2706_v17  ;;  %v2103_v25 = vld [vmem:[%s3615_s3] ss:$0 sm:$0xff]  ;;  %s3617_s21 = scalar_lea.vmem %s3616_s11, %s3165_s29 }
 0x23c   : > { %2175 = vmatpush3.bf16.msra.mxu0 %v2392_v21  ;;  %v2099_v27 = vld [vmem:[%s3617_s21] ss:$0 sm:$0xff]  ;;  %s3620_s7 = scalar_lea.vmem %s3619_s14, %s3658_s6  ;;  %s3621_s6 = scalar_lea.vmem [#allocation8], %s3152_s26 }
 0x23d   : > { %2185 = vmatmul.mubr.msk.bf16.vlgmr.msra.gmra.mrb[0].mxu1 %vm1057_vm2, %v1033_v22  ;;  %2188 = vmatprep.subr.bf16.mxu0 %v2706_v17  ;;  %v2111_v51 = vld [vmem:[%s3620_s7] ss:$0 sm:$0xff]  ;;  %v2395_v14 = vld [vmem:[%s3621_s6] sm:$0xff]   ;;  %s3622_s4 = smov %s3621_s6  ;;  %s3624_s18 = scalar_lea.vmem %s3623_s30, %s3165_s29 }
 0x23e   : > { %2198 = vmatprep.mubr.msk.bf16.mxu1 %vm2707_vm1, %v2706_v17  ;;  %v2396_v15 = vld [vmem:[%s3622_s4 + $0x8] sm:$0xff]   ;;  %s3626_s10 = scalar_lea.vmem %s3625_s22, %s3165_s29  ;;  %s2135_s23 = sshll.u32 %s3631_s1, 7 }
 0x23f   : > { %2177 = vmatmul.mubr.msk.bf16.vlgmr.msra.gmra.mrb[0].mxu0 %vm1057_vm2, %v1033_v22  ;;  %s2567_s22 = scalar_lea.vmem %s3393_s27, 128 }
 0x240   : > { %2192 = vmatprep.mubr.msk.bf16.mxu0 %vm2707_vm1, %v2706_v17  ;;  %2189 = vmatpush3.bf16.msra.mxu0 %v2393_v23  ;;  %s3391_s3 = scalar_lea.hbm %s3635_s16, %s2135_s23  ;;  %p2568_p13 = scmp.ne.s32.totalorder %s3393_s27, %s2567_s22 }
 0x241   : > { %2190 = vmatprep.subr.bf16.mxu0 %v2706_v17 }
 0x244   : > { %2191 = vmatpush3.bf16.msra.mxu0 %v2394_v24 }
 0x245   : > { %2202 = vmatprep.subr.bf16.mxu0 %v2706_v17 }
 0x247   : > { %2193 = vmatmul.mubr.msk.bf16.vlgmr.msra.gmra.mrb[4].mxu0 %vm1057_vm2, %v1033_v22 }
 0x248   : > { %2204 = vmatprep.mubr.msk.bf16.mxu0 %vm2707_vm1, %v2706_v17 }
 0x310   : > { %v1158_v26 = vpop.f32.mrb[0].mxu1 }
 0x311   : > { %v1159_v28 = vadd.f32 %v2103_v25, %v1158_v26  ;;  %v2186_v29 = vpop.f32.mrb[1].mxu1 }
 0x312   : > { %v1161_v30 = vpop.f32.mrb[2].mxu1  ;;  %v1095_v31 = vpop.f32.mrb[0].mxu0 }
 0x313   : > { %v1231_v32 = vpack.c.bf16 %v1159_v28, %v1159_v28  ;;  %v2187_v33 = vpop.f32.mrb[3].mxu1  ;;  %v1096_v34 = vadd.f32 %v2099_v27, %v1095_v31  ;;  %v2178_v35 = vpop.f32.mrb[1].mxu0 }
 0x314   : > { %v1098_v36 = vpop.f32.mrb[2].mxu0 }
 0x315   : > { %v1250_v37 = vsel %vm1245_vm3, %v1231_v32, 0  ;;  %1233 = vrot.lane.b32.xlu0 %v1231_v32, %s2708_s20  ;;  %v1227_v38 = vpack.c.bf16 %v1096_v34, %v1096_v34  ;;  %v2179_v39 = vpop.f32.mrb[3].mxu0 }
 0x316   : > { %2197 = vmatpush3.bf16.xpose.msra.mxu1 %v1250_v37 }
 0x317   : > { %2208 = vmatprep.subr.bf16.mxu1 %v2706_v17 }
 0x319   : > { %1229 = vrot.lane.b32.xlu0 %v1227_v38, %s2708_s20 }
 0x31a   : > { %v1221_v41 = vpop.f32.mrb[4].mxu0 }
 0x31b   : > { %v1222_v42 = vadd.f32 %v2107_v40, %v1221_v41  ;;  %v2194_v43 = vpop.f32.mrb[5].mxu0 }
 0x31c   : > { %v1224_v44 = vpop.f32.mrb[6].mxu0 }
 0x31d   : > { %2199 = vmatmul.mubr.msk.bf16.vlgmr.msra.gmra.mrb[4].mxu1 %vm1245_vm3, %v1227_v38  ;;  %v1235_v45 = vpack.c.bf16 %v1222_v42, %v1222_v42  ;;  %v2195_v46 = vpop.f32.mrb[7].mxu0 }
 0x31e   : > { %2210 = vmatprep.mubr.msk.bf16.mxu1 %vm2707_vm1, %v2706_v17 }
 0x31f   : > { %v1374_v47 = vsel %vm1372_vm4, %v1235_v45, 0 }
 0x320   : > { %2209 = vmatpush3.bf16.msra.mxu1 %v1374_v47 }
 0x321   : > { %2220 = vmatprep.subr.bf16.mxu1 %v2706_v17 }
 0x387   : > { %v1234_v48 = vpop.permute.xlu0 %1233 }
 0x388   : > { %v1296_v49 = vsel %vm1245_vm3, %v1234_v48, 0  ;;  %v2116_v48 = vld [vmem:[%s3624_s18] ss:$0 sm:$0xff] }
 0x389   : > { %2203 = vmatpush3.bf16.xpose.msra.mxu0 %v1296_v49 }
 0x38a   : > { %2214 = vmatprep.subr.bf16.mxu0 %v2706_v17 }
 0x38b   : > { %v1230_v50 = vpop.permute.xlu0 %1229 }
 0x390   : > { %2205 = vmatmul.mubr.msk.bf16.vlgmr.msra.gmra.mrb[8].mxu0 %vm1245_vm3, %v1230_v50 }
 0x391   : > { %2216 = vmatprep.mubr.msk.bf16.mxu0 %vm2707_vm1, %v2706_v17 }
 0x3f0   : > { %v1286_v52 = vpop.f32.mrb[4].mxu1 }
 0x3f1   : > { %v1287_v53 = vadd.f32 %v2111_v51, %v1286_v52  ;;  %v2200_v54 = vpop.f32.mrb[5].mxu1 }
 0x3f2   : > { %v1289_v55 = vpop.f32.mrb[6].mxu1 }
 0x3f3   : > { %v2201_v56 = vpop.f32.mrb[7].mxu1  ;;  %v1339_v57 = vsel %vm1338_vm5, %v1287_v53, -inf }
 0x3f4   : > { %1340 = vmax.xlane.f32.xlu0 %v1339_v57 }
 0x463   : > { %v1332_v58 = vpop.f32.mrb[8].mxu0 }
 0x464   : > { %v1333_v59 = vadd.f32 %v2111_v51, %v1332_v58  ;;  %v2206_v60 = vpop.f32.mrb[9].mxu0 }
 0x465   : > { %v1335_v61 = vpop.f32.mrb[10].mxu0 }
 0x466   : > { %v2207_v62 = vpop.f32.mrb[11].mxu0  ;;  %v1342_v63 = vsel %vm1338_vm5, %v1333_v59, -inf  ;;  %v2397_v61 = vld [vmem:[%s820_s28] sm:$0xff]  }
 0x467   : > { %1343 = vmax.xlane.f32.xlu1 %v1342_v63 }
 0x478   : > { %1237 = vrot.lane.b32.xlu1 %v1235_v45, %s2708_s20  ;;  %s3627_s20 = sld [smem:[#allocation48_spill]] }
 0x47e   : > { %s3628_s26 = scalar_lea.vmem %s3627_s20, %s3165_s29  ;;  %s2710_s29 = smov [#allocation11]  }
 0x481   : > { %v1341_v0 = vpop.xlane.xlu0 %1340 }
 0x482   : > { %v1351_v1 = vsub.f32 %v1287_v53, %v1341_v0  ;;  %v1345_v36 = vsub.f32 -inf, %v1341_v0 }
 0x484   : > { %v1353_v2 = vmul.f32 1.442695, %v1351_v1  ;;  %v1347_v37 = vmul.f32 1.442695, %v1345_v36 }
 0x486   : > { %2403 = vpow2.f32 %v1353_v2  ;;  %v2120_v2 = vld [vmem:[%s3626_s10] ss:$0 sm:$0xff] }
 0x490   : > { %v2404_v3 = vpop.eup %2403 }
 0x491   : > { %v1359_v4 = vsel %vm1338_vm5, %v2404_v3, 0.0  ;;  %v1367_v5 = vpack.c.bf16 %v2404_v3, %v2404_v3 }
 0x492   : > { %1360 = vadd.xlane.f32.xlu0 %v1359_v4  ;;  %v2121_v4 = vld [vmem:[%s3628_s26] ss:$0 sm:$0xff] }
 0x493   : > { %2211 = vmatmul.mubr.msk.bf16.vlgmr.msra.gmra.mrb[8].mxu1 %vm1338_vm5, %v1367_v5 }
 0x494   : > { %2224 = vmatprep.mubr.msk.bf16.mxu1 %vm2707_vm1, %v2706_v17  ;;  %2221 = vmatpush3.bf16.msra.mxu1 %v2395_v14 }
 0x495   : > { %2222 = vmatprep.subr.bf16.mxu1 %v2706_v17 }
 0x498   : > { %2223 = vmatpush3.bf16.msra.mxu1 %v2396_v15 }
 0x499   : > { %2236 = vmatprep.subr.bf16.mxu1 %v2706_v17 }
 0x4f4   : > { %v1344_v6 = vpop.xlane.xlu1 %1343 }
 0x4f5   : > { %v1352_v7 = vsub.f32 %v1333_v59, %v1344_v6  ;;  %v1346_v22 = vsub.f32 -inf, %v1344_v6 }
 0x4f7   : > { %v1355_v8 = vmul.f32 1.442695, %v1352_v7  ;;  %v1349_v23 = vmul.f32 1.442695, %v1346_v22 }
 0x4f8   : > { %v1238_v9 = vpop.permute.xlu1 %1237 }
 0x4f9   : > { %v1420_v10 = vsel %vm1372_vm4, %v1238_v9, 0  ;;  %2405 = vpow2.f32 %v1355_v8  ;;  %v2399_v8 = vld [vmem:[%s3219_s17] sm:$0xff]   ;;  %v2400_v9 = vld [vmem:[%s3219_s17 + $0x8] sm:$0xff]  }
 0x4fa   : > { %2215 = vmatpush3.bf16.msra.mxu0 %v1420_v10  ;;  %2407 = vpow2.f32 %v1349_v23  ;;  %v2401_v10 = vld [vmem:[%s3219_s17 + $0x10] sm:$0xff]  }
 0x4fb   : > { %2228 = vmatprep.subr.bf16.mxu0 %v2706_v17 }
 0x503   : > { %v2406_v11 = vpop.eup %2405 }
 0x504   : > { %v1362_v12 = vsel %vm1338_vm5, %v2406_v11, 0.0  ;;  %v1368_v13 = vpack.c.bf16 %v2406_v11, %v2406_v11  ;;  %v2408_v24 = vpop.eup %2407  ;;  %v2402_v11 = vld [vmem:[%s3219_s17 + $0x18] sm:$0xff]  }
 0x505   : > { %1363 = vadd.xlane.f32.xlu1 %v1362_v12  ;;  %v1358_v26 = vmul.f32 0.0, %v2408_v24  ;;  %v2122_v12 = vld [vmem:[%s978_s13] ss:$0 sm:$0xff] }
 0x506   : > { %2217 = vmatmul.mubr.msk.bf16.vlgmr.msra.gmra.mrb[12].mxu0 %vm1338_vm5, %v1368_v13 }
 0x507   : > { %2232 = vmatprep.mubr.msk.bf16.mxu0 %vm2707_vm1, %v2706_v17  ;;  %2229 = vmatpush3.bf16.msra.mxu0 %v2397_v61 }
 0x508   : > { %2230 = vmatprep.subr.bf16.mxu0 %v2706_v17 }
 0x51f   : > { %v1361_v39 = vpop.xlane.xlu0 %1360 }
 0x566   : > { %v1410_v16 = vpop.f32.mrb[8].mxu1 }
 0x567   : > { %v2212_v18 = vpop.f32.mrb[9].mxu1 }
 0x568   : > { %v1413_v19 = vpop.f32.mrb[10].mxu1 }
 0x569   : > { %v2213_v21 = vpop.f32.mrb[11].mxu1 }
 0x592   : > { %v1364_v25 = vpop.xlane.xlu1 %1363 }
 0x593   : > { %v1366_v27 = vadd.f32 %v1364_v25, %v1358_v26 }
 0x595   : > { %2409 = vrcp.f32 %v1366_v27 }
 0x596   : > { %2411 = vpow2.f32 %v1347_v37 }
 0x59f   : > { %v2410_v31 = vpop.eup %2409 }
 0x5a0   : > { %v2412_v38 = vpop.eup %2411 }
 0x5a1   : > { %v1357_v40 = vmul.f32 0.0, %v2412_v38 }
 0x5a3   : > { %v1365_v41 = vadd.f32 %v1361_v39, %v1357_v40  ;;  %v1462_v42 = vadd.f32 %v1410_v16, %v1357_v40 }
 0x5a5   : > { %2413 = vrcp.f32 %v1365_v41 }
 0x5af   : > { %v2414_v43 = vpop.eup %2413 }
 0x5b0   : > { %v1466_v44 = vmul.f32 %v2414_v43, %v1462_v42 }
 0x5b2   : > { %v1468_v45 = vpack.c.bf16 %v1466_v44, %v1466_v44 }
 0x5d9   : > { %v1456_v28 = vpop.f32.mrb[12].mxu0 }
 0x5da   : > { %v1463_v29 = vadd.f32 %v1456_v28, %v1358_v26  ;;  %v2218_v30 = vpop.f32.mrb[13].mxu0 }
 0x5db   : > { %v1459_v32 = vpop.f32.mrb[14].mxu0 }
 0x5dc   : > { %v1467_v33 = vmul.f32 %v2410_v31, %v1463_v29  ;;  %v2219_v34 = vpop.f32.mrb[15].mxu0  ;;  %v2126_v29 = vld [vmem:[%s986_s8] ss:$0 sm:$0xff]  ;;  %s3632_s8 = sld [smem:[#allocation32_spill]] }
 0x5de   : > { %v1469_v35 = vpack.c.bf16 %v1467_v33, %v1467_v33 }
 0x5e0   : > { %1471 = vrot.lane.b32.xlu0 %v1469_v35, %s2709_s0 }
 0x5e2   : > { %p3636_p4 = scmp.ne.s32.totalorder %s3632_s8, 0 }
 0x5e4   : > { %p2569_p2 = pnand %p2568_p13, %p3636_p4 }
 0x5e6   : > { %p2570_p8 = pneg %p2569_p2 }
 0x652   : > { %v1472_v46 = vpop.permute.xlu0 %1471 }
 0x653   : > { %v1475_v47 = vsel %vm1245_vm3, %v1468_v45, %v1472_v46  ;;  %v2132_v46 = vld [vmem:[%s989_s24] ss:$0 sm:$0xff]  ;;  %s1764_s24 = scalar_lea.sflag [#allocation4], %s3134_s19 }
 0x654   : > { %2225 = vmatmul.mubr.msk.bf16.vlgmr.msra.gmra.mrb[12].mxu1 %vm1057_vm2, %v1475_v47 }
 0x655   : > { %2244 = vmatprep.mubr.msk.bf16.mxu1 %vm2707_vm1, %v2706_v17  ;;  %2237 = vmatpush3.bf16.msra.mxu1 %v2399_v8 }
 0x656   : > { %2238 = vmatprep.subr.bf16.mxu1 %v2706_v17 }
 0x659   : > { %2239 = vmatpush3.bf16.msra.mxu1 %v2400_v9 }
 0x65a   : > { %2240 = vmatprep.subr.bf16.mxu1 %v2706_v17 }
 0x65d   : > { %2241 = vmatpush3.bf16.msra.mxu1 %v2401_v10 }
 0x65e   : > { %2242 = vmatprep.subr.bf16.mxu1 %v2706_v17 }
 0x661   : > { %2243 = vmatpush3.bf16.msra.mxu1 %v2402_v11 }
 0x727   : > { %v1535_v49 = vpop.f32.mrb[12].mxu1 }
 0x728   : > { %v1536_v50 = vadd.f32 %v2116_v48, %v1535_v49  ;;  %v2226_v51 = vpop.f32.mrb[13].mxu1  ;;  %v2133_v48 = vld [vmem:[%s992_s9] ss:$0 sm:$0xff]  ;;  %s2571_s9 = sshll.u32 %s2710_s29, 4  ;;  %s2572_s9 = int_to_ptr.vmem [resolvable:$false] %s2571_s9 }
 0x729   : > { %v1538_v52 = vpop.f32.mrb[14].mxu1  ;;  %s2573_s10 = scalar_lea.vmem %s2572_s9, 256  ;;  %p2574_p6 = scmp.lt.s32.totalorder %s3393_s27, %s2572_s9 }
 0x72a   : > { %v2227_v53 = vpop.f32.mrb[15].mxu1  ;;  %v1541_v54 = vadd.f32 %v1536_v50, %v3253_v20  ;;  %v2398_v20 = vld [vmem:[%s820_s28 + $0x8] sm:$0xff]   ;;  %p2575_p5 = scmp.lt.s32.totalorder %s2573_s10, %s2567_s22 }
 0x72b   : > { %2231 = vmatpush3.bf16.msra.mxu0 %v2398_v20 }
 0x72c   : > { %v1544_v55 = vsel %vm1057_vm2, %v1541_v54, 0.0  ;;  %p2576_p0 = por %p2575_p5, %p2574_p6 }
 0x72d   : > { %1545 = vadd.xlane.f32.xlu1 %v1544_v55 }
 0x72e   : > { %p2577_p1 = pnand %p2576_p0, %p2570_p8 }
 0x7ba   : > { %v1546_v56 = vpop.xlane.xlu1 %1545 }
 0x7bb   : > { %v1548_v57 = vmul.f32 0.03125, %v1546_v56 }
 0x7bd   : > { %v1549_v58 = vsub.f32 %v1541_v54, %v1548_v57 }
 0x7bf   : > { %v1550_v59 = vmul.f32 %v1549_v58, %v1549_v58 }
 0x7c1   : > { %v1551_v60 = vsel %vm1057_vm2, %v1550_v59, 0.0 }
 0x7c2   : > { %1552 = vadd.xlane.f32.xlu1 %v1551_v60 }
 0x84f   : > { %v1553_v62 = vpop.xlane.xlu1 %1552 }
 0x850   : > { %v1554_v63 = vmul.f32 0.03125, %v1553_v62 }
 0x852   : > { %v1555_v0 = vadd.f32 1e-12, %v1554_v63 }
 0x854   : > { %2415 = vrsqrt.f32 %v1555_v0 }
 0x85e   : > { %v2416_v1 = vpop.eup %2415 }
 0x85f   : > { %v1557_v3 = vmul.f32 %v2416_v1, %v1549_v58 }
 0x861   : > { %v1564_v5 = vmul.f32 %v2120_v2, %v1557_v3 }
 0x863   : > { %v1571_v6 = vadd.f32 %v2121_v4, %v1564_v5 }
 0x865   : > { %v1572_v7 = vpack.c.bf16 %v1571_v6, %v1571_v6 }
 0x867   : > { %2233 = vmatmul.mubr.msk.bf16.vlgmr.msra.gmra.mrb[16].mxu0 %vm1057_vm2, %v1572_v7 }
 0x93a   : > { %v1633_v13 = vpop.f32.mrb[16].mxu0 }
 0x93b   : > { %v1634_v14 = vadd.f32 %v2122_v12, %v1633_v13  ;;  %v2234_v15 = vpop.f32.mrb[17].mxu0 }
 0x93c   : > { %v1636_v16 = vpop.f32.mrb[18].mxu0 }
 0x93d   : > { %v1640_v18 = vmul.f32 0.044715, %v1634_v14  ;;  %v2235_v19 = vpop.f32.mrb[19].mxu0  ;;  %v1639_v17 = vmul.f32 0.5, %v1634_v14 }
 0x93f   : > { %v1641_v21 = vmul.f32 %v1640_v18, %v1634_v14 }
 0x941   : > { %v1642_v22 = vmul.f32 %v1641_v21, %v1634_v14 }
 0x943   : > { %v1643_v23 = vadd.f32 %v1642_v22, %v1634_v14 }
 0x945   : > { %v1644_v24 = vmul.f32 0.7978846, %v1643_v23 }
 0x947   : > { %2417 = vtanh.f32 %v1644_v24 }
 0x951   : > { %v2418_v25 = vpop.eup %2417 }
 0x952   : > { %v1646_v26 = vadd.f32 1.0, %v2418_v25 }
 0x954   : > { %v1647_v27 = vmul.f32 %v1646_v26, %v1639_v17 }
 0x956   : > { %v1648_v28 = vpack.c.bf16 %v1647_v27, %v1647_v27 }
 0x958   : > { %2245 = vmatmul.mubr.msk.bf16.vlgmr.msra.gmra.mrb[16].mxu1 %vm1688_vm6, %v1648_v28 }
 0xa2b   : > { %v1726_v30 = vpop.f32.mrb[16].mxu1 }
 0xa2c   : > { %v1727_v31 = vadd.f32 %v2126_v29, %v1726_v30  ;;  %v2246_v32 = vpop.f32.mrb[17].mxu1 }
 0xa2d   : > { %v1729_v33 = vpop.f32.mrb[18].mxu1 }
 0xa2e   : > { %v2247_v34 = vpop.f32.mrb[19].mxu1  ;;  %v1732_v35 = vadd.f32 %v1727_v31, %v1571_v6 }
 0xa30   : > { %v1735_v36 = vsel %vm1057_vm2, %v1732_v35, 0.0 }
 0xa31   : > { %1736 = vadd.xlane.f32.xlu0 %v1735_v36 }
 0xabe   : > { %v1737_v37 = vpop.xlane.xlu0 %1736 }
 0xabf   : > { %v1738_v38 = vmul.f32 0.03125, %v1737_v37 }
 0xac1   : > { %v1739_v39 = vsub.f32 %v1732_v35, %v1738_v38 }
 0xac3   : > { %v1740_v40 = vmul.f32 %v1739_v39, %v1739_v39 }
 0xac5   : > { %v1741_v41 = vsel %vm1057_vm2, %v1740_v40, 0.0 }
 0xac6   : > { %1742 = vadd.xlane.f32.xlu1 %v1741_v41 }
 0xb53   : > { %v1743_v42 = vpop.xlane.xlu1 %1742 }
 0xb54   : > { %v1744_v43 = vmul.f32 0.03125, %v1743_v42 }
 0xb56   : > { %v1745_v44 = vadd.f32 1e-12, %v1744_v43 }
 0xb58   : > { %2419 = vrsqrt.f32 %v1745_v44 }
 0xb62   : > { %v2420_v45 = vpop.eup %2419 }
 0xb63   : > { %v1747_v47 = vmul.f32 %v2420_v45, %v1739_v39 }
 0xb65   : > { %v1754_v49 = vmul.f32 %v2132_v46, %v1747_v47 }
 0xb67   : > { %v1761_v50 = vadd.f32 %v2133_v48, %v1754_v49 }
 0xb69   : > { %1762 = vst.msk [vmem:[%s3236_s15] sm:$0xff] %vm1057_vm2, %v1761_v50 }
 0xb6a   : > { %2580 = shalt.err (!%p2577_p1)
}
 0xb6b   : > { %s2581_s19 = scalar_lea.hbm %s3391_s3, 128  ;;  %s2585_s21 = scalar_lea.hbm %s3635_s16, 256 }
 0xb6c   : > { %p2582_p9 = scmp.ne.s32.totalorder %s3391_s3, %s2581_s19  ;;  %p2586_p7 = scmp.lt.u32.totalorder %s3391_s3, %s3635_s16 }
 0xb6d   : > { %p2587_p11 = scmp.lt.u32.totalorder %s2585_s21, %s2581_s19  ;;  %p2589_p13 = scmp.lt.u32.totalorder %s2581_s19, %s3391_s3 }
 0xb6e   : > { %p2583_p10 = pnand %p2582_p9, %p3636_p4 }
 0xb6f   : > { %p2588_p12 = por %p2587_p11, %p2586_p7 }
 0xb70   : > { %p2584_p3 = pneg %p2583_p10 }
 0xb71   : > { %p2590_p2 = por %p2589_p13, %p2588_p12 }
 0xb73   : > { %p2591_p8 = pnand %p2590_p2, %p2584_p3 }
 0xb75   : > { %2594 = shalt.err (!%p2591_p8)
}
 0xb76   : > { %2262 = dma.vmem_to_hbm [thread:$0]  (%p3636_p4), %s3393_s27, 128, %s3391_s3, %s1764_s24  }
 0xb77 PF: > { %s3637_s28 = sld [smem:[#allocation25_spill]]  ;;  %s3638_s25 = sld [smem:[#allocation18_spill]] }
 0xb78   : > { %s3639_s2 = sld [smem:[#allocation33_spill]] }
 0xb7d   : > { %p2290_p6 = scmp.ge.s32.totalorder %s3637_s28, 2  ;;  %s1789_s13 = sand.u32 1, %s3638_s25  }
 0xb7e   : > { %p3640_p5 = scmp.ne.s32.totalorder %s3639_s2, 0  ;;  %s1790_s17 = scalar_lea.sflag [#allocation4], %s1789_s13 }
 0xb80   : > { %p2282_p0 = pnand %p2290_p6, %p3640_p5 }
 0xb82   : > { %2652 = dma.done.wait (!%p2282_p0), %s1790_s17, 128  }
 0xb83   : > { %2654 = vsyncadd (!%p2282_p0), %s1790_s17, 4294967168  ;;  %s40_s4 = sadd.s32 1, %s3637_s28   ;;  %s3641_s1 = sld [smem:[#allocation16_spill]] }
 0xb84   : > { %p37_p1 = scmp.ge.s32.totalorder %s40_s4, 6   ;;  %s3642_s22 = sld [smem:[#allocation17_spill]] }
 0xb85   : > { %s3643_s23 = sld [smem:[#allocation29_spill]]  ;;  %s3644_s24 = sld [smem:[#allocation19_spill]] }
 0xb86   : > { %s3645_s2 = sld [smem:[#allocation20_spill]]  ;;  %s3646_s25 = sld [smem:[#allocation34_spill]] }
 0xb87   : > { %s3647_s3 = sld [smem:[#allocation23_spill]]  ;;  %s3648_s26 = sld [smem:[#allocation24_spill]] }
 0xb88   : > { %s3649_s27 = sld [smem:[#allocation28_spill]]  ;;  %s3650_s28 = sld [smem:[#allocation31_spill]] }
 0xb89   :  { %39 = sbr.rel (!%p37_p1) target bundleno = 34 (0x22), region = 226 }
 0xb90   :  { %1795 = vsyncpa [#allocation3], 1 }
 0xb91   :  { %1797 = vsyncpa [#allocation3 + $0x1], 1 }
 0xb92   :  { %1798 = vsyncpa [#allocation6], 1 }
 0xb93   :  { %1799 = vsyncpa [#allocation9], 1 }
 0xb94   :  { %1801 = vsyncpa [#allocation9 + $0x1], 1 }
 0xb95   :  { %1802 = vsyncpa [#allocation4], 1 }
 0xb96   :  { %1804 = vsyncpa [#allocation4 + $0x1], 1 }

</bundles_post_ra>
